<compile_context>
chip_gen: v7x
topology: tpu7x:2x2x1
jax: 0.10.0
libtpu: 0.0.40
codegen_flags: <defaults>
</compile_context>

<pallas_src>
import jax
import jax.numpy as jnp
from jax import lax
from jax.experimental import pallas as pl
from jax.experimental.pallas import tpu as pltpu


# ----------------------------------------------------------------------------
# Fused kernel: conv(k=2, pad=1) + bias + ReLU + maxpool(2, s=1) + LSTM(36->1)
# Layout: time/features in rows (sublanes / major dims), batch in lanes.
# ----------------------------------------------------------------------------
def make_fused_kernel(S, B, M):
    Fin = 2 * M          # conv-input features per padded timestep (cin*2 + w)
    FP = 40              # pooled features 36, padded to 40 for 8-row alignment
    O = 2 * FP           # conv rows: [left 36 | pad 4 | right 36 | pad 4]

    def kernel(x_ref, cw_ref, lstm_ref, o_ref, gx_scr):
        # x_ref   : (S+2, 2M, B)  height-padded input, batch in lanes
        # cw_ref  : (80, 4M+1)    [W_kh0 | W_kh1 | bias column]
        # lstm_ref: (4, 42)       [W_ih^T (gate-reordered, 40) | W_hh | bias]
        # o_ref   : (S, B)        per-step hidden state (lane-dense output)
        # gx_scr  : (S, 4, B)     VMEM gate pre-activations

        # ---- Conv2d + bias + ReLU + MaxPool (all batched MXU / VPU work) ----
        w0 = jnp.broadcast_to(cw_ref[:, 0:Fin], (S + 1, O, Fin))       # kh = 0
        w1 = jnp.broadcast_to(cw_ref[:, Fin:2 * Fin], (S + 1, O, Fin))  # kh = 1
        bc = cw_ref[:, 2 * Fin:2 * Fin + 1]                             # (80, 1)
        conv = (jnp.einsum('sof,sfb->sob', w0, x_ref[0:S + 1],
                           preferred_element_type=jnp.float32)
                + jnp.einsum('sof,sfb->sob', w1, x_ref[1:S + 2],
                             preferred_element_type=jnp.float32)
                + bc[None, :, :])                                       # (S+1, 80, B)
        conv = jnp.maximum(conv, 0.0)                                   # ReLU
        # width max-pool: left/right candidate halves at 8-aligned row offsets
        wmax = jnp.maximum(conv[:, 0:FP, :], conv[:, FP:O, :])          # (S+1, 40, B)
        # height max-pool: adjacent conv rows (major-dim slices, no relayout)
        feats = jnp.maximum(wmax[0:S, :, :], wmax[1:S + 1, :, :])       # (S, 40, B)

        # ---- gate pre-activations for ALL timesteps (hoisted off the loop) --
        wih = jnp.broadcast_to(lstm_ref[:, 0:FP], (S, 4, FP))           # (S, 4, 40)
        whh = lstm_ref[:, FP:FP + 1]                                    # (4, 1)
        bl = lstm_ref[:, FP + 1:FP + 2]                                 # (4, 1)
        gx_scr[...] = (jnp.einsum('sgf,sfb->sgb', wih, feats,
                                  preferred_element_type=jnp.float32)
                       + bl[None, :, :])                                # (S, 4, B)

        whh_b = jnp.broadcast_to(whh, (4, B))   # hoisted loop-invariant broadcast

        # ---- serial LSTM recurrence: gates in sublanes, batch in lanes ------
        def step(t, carry):
            h, c = carry                                   # (1, B), (1, B)
            g = gx_scr[t] + whh_b * h                      # (4, B): i, f, o, g
            sig = jax.nn.sigmoid(g[0:3, :])                # one EUP pass: i, f, o
            gg = jnp.tanh(g[3:4, :])
            c_n = sig[1:2, :] * c + sig[0:1, :] * gg
            h_n = sig[2:3, :] * jnp.tanh(c_n)
            o_ref[pl.ds(t, 1), :] = h_n                    # lane-dense row store
            return (h_n, c_n)

        zero = jnp.zeros((1, B), jnp.float32)
        lax.fori_loop(0, S, step, (zero, zero),
                      unroll=True if S <= 32 else 8)

    return kernel


# ----------------------------------------------------------------------------
# One-time weight packing (call OUTSIDE jit; not re-traced per forward)
# ----------------------------------------------------------------------------
def pack_nn_params(wconv_pt, bconv, wih, whh, blstm):
    """Repack PyTorch-layout weights into the kernel's fused layouts.

    wconv_pt: (18, M, 2, 2)  Conv2d weight (cout, cin, kh, kw)
    bconv:    (18,)          Conv2d bias
    wih:      (36, 4)        LSTM W_ih (used as x @ W_ih), blitz gate order i,f,g,o
    whh:      (1, 4)         LSTM W_hh (used as h @ W_hh)
    blstm:    (4,)           combined LSTM bias (b_ih + b_hh)
    """
    C, M, KH, KW = wconv_pt.shape
    assert (C, KH, KW) == (18, 2, 2)
    F = 2 * C            # 36 pooled features (index = c*2 + w_out)
    FP = 40
    O = 2 * FP
    Fin = 2 * M

    w = jnp.asarray(wconv_pt, jnp.float32)
    tap = lambda kh, kw: w[:, :, kh, kw]                    # (C, M)
    zz = jnp.zeros((C, M), jnp.float32)

    def half(kh, which):
        # rows r = c*2 + w_out, cols j = cin*2 + w_in
        if which == "left":      # conv width position = w_out
            r0 = jnp.stack([tap(kh, 1), zz], axis=-1)            # w_out = 0
            r1 = jnp.stack([tap(kh, 0), tap(kh, 1)], axis=-1)    # w_out = 1
        else:                    # conv width position = w_out + 1
            r0 = jnp.stack([tap(kh, 0), tap(kh, 1)], axis=-1)    # w_out = 0
            r1 = jnp.stack([zz, tap(kh, 0)], axis=-1)            # w_out = 1
        return jnp.stack([r0, r1], axis=1).reshape(F, Fin)       # (36, 2M)

    padrows = jnp.zeros((FP - F, Fin), jnp.float32)

    def wk(kh):
        return jnp.concatenate([half(kh, "left"), padrows,
                                half(kh, "right"), padrows], axis=0)   # (80, 2M)

    bhalf = jnp.concatenate([jnp.repeat(jnp.asarray(bconv, jnp.float32), 2),
                             jnp.zeros((FP - F,), jnp.float32)])
    bcol = jnp.concatenate([bhalf, bhalf]).reshape(O, 1)                # (80, 1)
    conv_pack = jnp.concatenate([wk(0), wk(1), bcol], axis=1)           # (80, 4M+1)

    # LSTM: reorder gates (i, f, g, o) -> (i, f, o, g); zero-pad features to 40
    perm = jnp.array([0, 1, 3, 2], jnp.int32)
    wihT = jnp.asarray(wih, jnp.float32).T[perm, :]                     # (4, 36)
    wihT = jnp.concatenate([wihT, jnp.zeros((4, FP - F), jnp.float32)], axis=1)
    whh_col = jnp.asarray(whh, jnp.float32).reshape(4)[perm].reshape(4, 1)
    bl_col = jnp.asarray(blstm, jnp.float32)[perm].reshape(4, 1)
    lstm_pack = jnp.concatenate([wihT, whh_col, bl_col], axis=1)        # (4, 42)

    return conv_pack, lstm_pack


# ----------------------------------------------------------------------------
# Forward wrapper (jit this): input layout + one fused pallas_call + transpose
# ----------------------------------------------------------------------------
def nn_forward(x, conv_pack, lstm_pack):
    B, S, M, W = x.shape
    assert W == 2, "last input dim must be 2 so that 18 * 2 == 36 LSTM features"
    Fin = 2 * M

    # (B, S, M, 2) -> (S, 2M, B) with batch in lanes, height pre-padded by 1
    x3 = jnp.transpose(x.astype(jnp.float32), (1, 2, 3, 0)).reshape(S, Fin, B)
    x3 = jnp.pad(x3, ((1, 1), (0, 0), (0, 0)))

    kernel = make_fused_kernel(S, B, M)
    hseq = pl.pallas_call(
        kernel,
        out_shape=jax.ShapeDtypeStruct((S, B), jnp.float32),
        scratch_shapes=[pltpu.VMEM((S, 4, B), jnp.float32)],
    )(x3, conv_pack, lstm_pack)

    return hseq.T                       # (B, S), matches np.squeeze(x_, axis=-1)


# ----------------------------------------------------------------------------
# Pure-JAX reference (XLA ops) for correctness checking
# ----------------------------------------------------------------------------
def nn_forward_reference(x, wconv_pt, bconv, wih, whh, blstm):
    B, S, M, W = x.shape
    xt = jnp.transpose(x, (0, 2, 1, 3))                       # (B, M, S, 2)
    conv = lax.conv_general_dilated(
        xt, wconv_pt, window_strides=(1, 1), padding=((1, 1), (1, 1)),
        dimension_numbers=("NCHW", "OIHW", "NCHW"))
    conv = conv + bconv[None, :, None, None]
    r = jnp.maximum(conv, 0.0)
    p = lax.reduce_window(r, -jnp.inf, lax.max,
                          (1, 1, 2, 2), (1, 1, 1, 1), "VALID")  # (B, 18, S, 2)
    feats = jnp.transpose(p, (0, 2, 1, 3)).reshape(B, S, 36)
    xs = jnp.transpose(feats, (1, 0, 2))                       # (S, B, 36)

    def step(carry, x_t):
        h, c = carry
        gates = x_t @ wih + h @ whh + blstm[None, :]           # i, f, g, o
        i_g = jax.nn.sigmoid(gates[:, 0:1])
        f_g = jax.nn.sigmoid(gates[:, 1:2])
        g_g = jnp.tanh(gates[:, 2:3])
        o_g = jax.nn.sigmoid(gates[:, 3:4])
        c = f_g * c + i_g * g_g
        h = o_g * jnp.tanh(c)
        return (h, c), h

    init = (jnp.zeros((B, 1), jnp.float32), jnp.zeros((B, 1), jnp.float32))
    _, hs = lax.scan(step, init, xs)                           # (S, B, 1)
    return hs[:, :, 0].T                                       # (B, S)


if __name__ == "__main__":
    B, S, M = 2, 8, 4        # batch, sequence_length, minute_sampe; width fixed at 2

    key = jax.random.PRNGKey(0)
    k1, k2, k3, k4, k5, k6 = jax.random.split(key, 6)
    x = jax.random.normal(k1, (B, S, M, 2), jnp.float32)
    wconv_pt = 0.3 * jax.random.normal(k2, (18, M, 2, 2), jnp.float32)
    bconv = 0.1 * jax.random.normal(k3, (18,), jnp.float32)
    wih = 0.3 * jax.random.normal(k4, (36, 4), jnp.float32)
    whh = 0.3 * jax.random.normal(k5, (1, 4), jnp.float32)
    blstm = 0.1 * jax.random.normal(k6, (4,), jnp.float32)   # = b_ih + b_hh combined

    conv_pack, lstm_pack = pack_nn_params(wconv_pt, bconv, wih, whh, blstm)
    conv_pack = jax.block_until_ready(conv_pack)
    lstm_pack = jax.block_until_ready(lstm_pack)

    fwd = jax.jit(nn_forward)
    out = jax.block_until_ready(fwd(x, conv_pack, lstm_pack))

    ref = jax.block_until_ready(
        nn_forward_reference(x, wconv_pt, bconv, wih, whh, blstm))

    assert out.shape == (B, S), out.shape
    if not bool(jnp.allclose(out, ref, atol=1e-4, rtol=1e-4)):
        raise AssertionError(f"mismatch: max abs err {jnp.max(jnp.abs(out - ref))}")

    print("KERNEL_OK")
</pallas_src>

<mosaic_0001>
module attributes {stable_mosaic.version = 11 : i64} {
  func.func @kernel(%arg0: memref<10x8x2xf32, #tpu.memory_space<vmem>>, %arg1: memref<80x17xf32, #tpu.memory_space<vmem>>, %arg2: memref<4x42xf32, #tpu.memory_space<vmem>>, %arg3: memref<8x2xf32, #tpu.memory_space<vmem>>, %arg4: memref<8x4x2xf32, #tpu.memory_space<vmem>>) attributes {dimension_semantics = [], scalar_prefetch = 0 : i64, scratch_operands = 1 : i64, tpu.core_type = #tpu.core_type<tc>} {
    %c0 = arith.constant 0 : index
    %c0_0 = arith.constant 0 : index
    %0 = vector.load %arg1[%c0, %c0_0] : memref<80x17xf32, #tpu.memory_space<vmem>>, vector<80x8xf32>
    %1 = vector.shape_cast %0 : vector<80x8xf32> to vector<1x80x8xf32>
    %2 = vector.broadcast %1 : vector<1x80x8xf32> to vector<9x80x8xf32>
    %c0_1 = arith.constant 0 : index
    %c8 = arith.constant 8 : index
    %3 = vector.load %arg1[%c0_1, %c8] : memref<80x17xf32, #tpu.memory_space<vmem>>, vector<80x8xf32>
    %4 = vector.shape_cast %3 : vector<80x8xf32> to vector<1x80x8xf32>
    %5 = vector.broadcast %4 : vector<1x80x8xf32> to vector<9x80x8xf32>
    %c0_2 = arith.constant 0 : index
    %c16 = arith.constant 16 : index
    %6 = vector.load %arg1[%c0_2, %c16] : memref<80x17xf32, #tpu.memory_space<vmem>>, vector<80x1xf32>
    %c0_3 = arith.constant 0 : index
    %c0_4 = arith.constant 0 : index
    %c0_5 = arith.constant 0 : index
    %7 = vector.load %arg0[%c0_3, %c0_4, %c0_5] : memref<10x8x2xf32, #tpu.memory_space<vmem>>, vector<9x8x2xf32>
    "tpu.trace_start"() <{level = 10 : i32, message = "sof,sfb->sob"}> : () -> ()
    %cst = arith.constant dense<0.000000e+00> : vector<9x80x2xf32>
    %8 = tpu.matmul %2, %7, %cst {dimension_numbers = #tpu.dot_dimension_numbers<[2], [1], [1], [2], [0, 0, 0, 1, 1, 2], [0], [0]>} : vector<9x80x8xf32>, vector<9x8x2xf32>, vector<9x80x2xf32> -> vector<9x80x2xf32>
    "tpu.trace_stop"() : () -> ()
    %c1 = arith.constant 1 : index
    %c0_6 = arith.constant 0 : index
    %c0_7 = arith.constant 0 : index
    %9 = vector.load %arg0[%c1, %c0_6, %c0_7] : memref<10x8x2xf32, #tpu.memory_space<vmem>>, vector<9x8x2xf32>
    "tpu.trace_start"() <{level = 10 : i32, message = "sof,sfb->sob"}> : () -> ()
    %cst_8 = arith.constant dense<0.000000e+00> : vector<9x80x2xf32>
    %10 = tpu.matmul %5, %9, %cst_8 {dimension_numbers = #tpu.dot_dimension_numbers<[2], [1], [1], [2], [0, 0, 0, 1, 1, 2], [0], [0]>} : vector<9x80x8xf32>, vector<9x8x2xf32>, vector<9x80x2xf32> -> vector<9x80x2xf32>
    "tpu.trace_stop"() : () -> ()
    %11 = arith.addf %8, %10 : vector<9x80x2xf32>
    %12 = vector.shape_cast %6 : vector<80x1xf32> to vector<1x80x1xf32>
    %13 = vector.broadcast %12 : vector<1x80x1xf32> to vector<9x80x2xf32>
    %14 = arith.addf %11, %13 : vector<9x80x2xf32>
    %cst_9 = arith.constant 0.000000e+00 : f32
    %15 = vector.broadcast %cst_9 : f32 to vector<9x80x2xf32>
    %16 = arith.maximumf %14, %15 : vector<9x80x2xf32>
    %17 = vector.extract_strided_slice %16 {offsets = [0, 0, 0], sizes = [9, 40, 2], strides = [1, 1, 1]} : vector<9x80x2xf32> to vector<9x40x2xf32>
    %18 = vector.extract_strided_slice %16 {offsets = [0, 40, 0], sizes = [9, 40, 2], strides = [1, 1, 1]} : vector<9x80x2xf32> to vector<9x40x2xf32>
    %19 = arith.maximumf %17, %18 : vector<9x40x2xf32>
    %20 = vector.extract_strided_slice %19 {offsets = [0, 0, 0], sizes = [8, 40, 2], strides = [1, 1, 1]} : vector<9x40x2xf32> to vector<8x40x2xf32>
    %21 = vector.extract_strided_slice %19 {offsets = [1, 0, 0], sizes = [8, 40, 2], strides = [1, 1, 1]} : vector<9x40x2xf32> to vector<8x40x2xf32>
    %22 = arith.maximumf %20, %21 : vector<8x40x2xf32>
    %c0_10 = arith.constant 0 : index
    %c0_11 = arith.constant 0 : index
    %23 = vector.load %arg2[%c0_10, %c0_11] : memref<4x42xf32, #tpu.memory_space<vmem>>, vector<4x40xf32>
    %24 = vector.shape_cast %23 : vector<4x40xf32> to vector<1x4x40xf32>
    %25 = vector.broadcast %24 : vector<1x4x40xf32> to vector<8x4x40xf32>
    %c0_12 = arith.constant 0 : index
    %c40 = arith.constant 40 : index
    %26 = vector.load %arg2[%c0_12, %c40] : memref<4x42xf32, #tpu.memory_space<vmem>>, vector<4x1xf32>
    %c0_13 = arith.constant 0 : index
    %c41 = arith.constant 41 : index
    %27 = vector.load %arg2[%c0_13, %c41] : memref<4x42xf32, #tpu.memory_space<vmem>>, vector<4x1xf32>
    "tpu.trace_start"() <{level = 10 : i32, message = "sgf,sfb->sgb"}> : () -> ()
    %cst_14 = arith.constant dense<0.000000e+00> : vector<8x4x2xf32>
    %28 = tpu.matmul %25, %22, %cst_14 {dimension_numbers = #tpu.dot_dimension_numbers<[2], [1], [1], [2], [0, 0, 0, 1, 1, 2], [0], [0]>} : vector<8x4x40xf32>, vector<8x40x2xf32>, vector<8x4x2xf32> -> vector<8x4x2xf32>
    "tpu.trace_stop"() : () -> ()
    %29 = vector.shape_cast %27 : vector<4x1xf32> to vector<1x4x1xf32>
    %30 = vector.broadcast %29 : vector<1x4x1xf32> to vector<8x4x2xf32>
    %31 = arith.addf %28, %30 : vector<8x4x2xf32>
    %c0_15 = arith.constant 0 : index
    %c0_16 = arith.constant 0 : index
    %c0_17 = arith.constant 0 : index
    %32 = vector.load %arg4[%c0_15, %c0_16, %c0_17] : memref<8x4x2xf32, #tpu.memory_space<vmem>>, vector<8x4x2xf32>
    tpu.vector_store %arg4[%c0_15, %c0_16, %c0_17], %31 {strides = array<i32>} : memref<8x4x2xf32, #tpu.memory_space<vmem>>, vector<8x4x2xf32>,
    %33 = vector.shape_cast %26 : vector<4x1xf32> to vector<4x1xf32>
    %34 = vector.broadcast %33 : vector<4x1xf32> to vector<4x2xf32>
    %cst_18 = arith.constant 0.000000e+00 : f32
    %35 = vector.broadcast %cst_18 : f32 to vector<1x2xf32>
    %c0_i32 = arith.constant 0 : i32
    %36 = arith.index_cast %c0_i32 : i32 to index
    %c0_19 = arith.constant 0 : index
    %c0_20 = arith.constant 0 : index
    %37 = vector.load %arg4[%36, %c0_19, %c0_20] : memref<8x4x2xf32, #tpu.memory_space<vmem>>, vector<1x4x2xf32>
    %38 = vector.shape_cast %37 : vector<1x4x2xf32> to vector<4x2xf32>
    %39 = vector.broadcast %35 : vector<1x2xf32> to vector<4x2xf32>
    %40 = arith.mulf %34, %39 : vector<4x2xf32>
    %41 = arith.addf %38, %40 : vector<4x2xf32>
    %42 = vector.extract_strided_slice %41 {offsets = [0, 0], sizes = [3, 2], strides = [1, 1]} : vector<4x2xf32> to vector<3x2xf32>
    %43 = arith.negf %42 : vector<3x2xf32>
    %44 = math.exp %43 : vector<3x2xf32>
    %cst_21 = arith.constant 1.000000e+00 : f32
    %45 = vector.broadcast %cst_21 : f32 to vector<3x2xf32>
    %46 = arith.addf %45, %44 : vector<3x2xf32>
    %47 = arith.divf %45, %46 : vector<3x2xf32>
    %48 = vector.extract_strided_slice %41 {offsets = [3, 0], sizes = [1, 2], strides = [1, 1]} : vector<4x2xf32> to vector<1x2xf32>
    %49 = math.tanh %48 : vector<1x2xf32>
    %50 = vector.extract_strided_slice %47 {offsets = [1, 0], sizes = [1, 2], strides = [1, 1]} : vector<3x2xf32> to vector<1x2xf32>
    %51 = arith.mulf %50, %35 : vector<1x2xf32>
    %52 = vector.extract_strided_slice %47 {offsets = [0, 0], sizes = [1, 2], strides = [1, 1]} : vector<3x2xf32> to vector<1x2xf32>
    %53 = arith.mulf %52, %49 : vector<1x2xf32>
    %54 = arith.addf %51, %53 : vector<1x2xf32>
    %55 = vector.extract_strided_slice %47 {offsets = [2, 0], sizes = [1, 2], strides = [1, 1]} : vector<3x2xf32> to vector<1x2xf32>
    %56 = math.tanh %54 : vector<1x2xf32>
    %57 = arith.mulf %55, %56 : vector<1x2xf32>
    %58 = arith.index_cast %c0_i32 : i32 to index
    %c0_22 = arith.constant 0 : index
    %59 = vector.load %arg3[%58, %c0_22] : memref<8x2xf32, #tpu.memory_space<vmem>>, vector<1x2xf32>
    tpu.vector_store %arg3[%58, %c0_22], %57 {strides = array<i32>} : memref<8x2xf32, #tpu.memory_space<vmem>>, vector<1x2xf32>,
    %c1_i32 = arith.constant 1 : i32
    %60 = arith.index_cast %c1_i32 : i32 to index
    %c0_23 = arith.constant 0 : index
    %c0_24 = arith.constant 0 : index
    %61 = vector.load %arg4[%60, %c0_23, %c0_24] : memref<8x4x2xf32, #tpu.memory_space<vmem>>, vector<1x4x2xf32>
    %62 = vector.shape_cast %61 : vector<1x4x2xf32> to vector<4x2xf32>
    %63 = vector.broadcast %57 : vector<1x2xf32> to vector<4x2xf32>
    %64 = arith.mulf %34, %63 : vector<4x2xf32>
    %65 = arith.addf %62, %64 : vector<4x2xf32>
    %66 = vector.extract_strided_slice %65 {offsets = [0, 0], sizes = [3, 2], strides = [1, 1]} : vector<4x2xf32> to vector<3x2xf32>
    %67 = arith.negf %66 : vector<3x2xf32>
    %68 = math.exp %67 : vector<3x2xf32>
    %cst_25 = arith.constant 1.000000e+00 : f32
    %69 = vector.broadcast %cst_25 : f32 to vector<3x2xf32>
    %70 = arith.addf %69, %68 : vector<3x2xf32>
    %71 = arith.divf %69, %70 : vector<3x2xf32>
    %72 = vector.extract_strided_slice %65 {offsets = [3, 0], sizes = [1, 2], strides = [1, 1]} : vector<4x2xf32> to vector<1x2xf32>
    %73 = math.tanh %72 : vector<1x2xf32>
    %74 = vector.extract_strided_slice %71 {offsets = [1, 0], sizes = [1, 2], strides = [1, 1]} : vector<3x2xf32> to vector<1x2xf32>
    %75 = arith.mulf %74, %54 : vector<1x2xf32>
    %76 = vector.extract_strided_slice %71 {offsets = [0, 0], sizes = [1, 2], strides = [1, 1]} : vector<3x2xf32> to vector<1x2xf32>
    %77 = arith.mulf %76, %73 : vector<1x2xf32>
    %78 = arith.addf %75, %77 : vector<1x2xf32>
    %79 = vector.extract_strided_slice %71 {offsets = [2, 0], sizes = [1, 2], strides = [1, 1]} : vector<3x2xf32> to vector<1x2xf32>
    %80 = math.tanh %78 : vector<1x2xf32>
    %81 = arith.mulf %79, %80 : vector<1x2xf32>
    %82 = arith.index_cast %c1_i32 : i32 to index
    %c0_26 = arith.constant 0 : index
    %83 = vector.load %arg3[%82, %c0_26] : memref<8x2xf32, #tpu.memory_space<vmem>>, vector<1x2xf32>
    tpu.vector_store %arg3[%82, %c0_26], %81 {strides = array<i32>} : memref<8x2xf32, #tpu.memory_space<vmem>>, vector<1x2xf32>,
    %c2_i32 = arith.constant 2 : i32
    %84 = arith.index_cast %c2_i32 : i32 to index
    %c0_27 = arith.constant 0 : index
    %c0_28 = arith.constant 0 : index
    %85 = vector.load %arg4[%84, %c0_27, %c0_28] : memref<8x4x2xf32, #tpu.memory_space<vmem>>, vector<1x4x2xf32>
    %86 = vector.shape_cast %85 : vector<1x4x2xf32> to vector<4x2xf32>
    %87 = vector.broadcast %81 : vector<1x2xf32> to vector<4x2xf32>
    %88 = arith.mulf %34, %87 : vector<4x2xf32>
    %89 = arith.addf %86, %88 : vector<4x2xf32>
    %90 = vector.extract_strided_slice %89 {offsets = [0, 0], sizes = [3, 2], strides = [1, 1]} : vector<4x2xf32> to vector<3x2xf32>
    %91 = arith.negf %90 : vector<3x2xf32>
    %92 = math.exp %91 : vector<3x2xf32>
    %cst_29 = arith.constant 1.000000e+00 : f32
    %93 = vector.broadcast %cst_29 : f32 to vector<3x2xf32>
    %94 = arith.addf %93, %92 : vector<3x2xf32>
    %95 = arith.divf %93, %94 : vector<3x2xf32>
    %96 = vector.extract_strided_slice %89 {offsets = [3, 0], sizes = [1, 2], strides = [1, 1]} : vector<4x2xf32> to vector<1x2xf32>
    %97 = math.tanh %96 : vector<1x2xf32>
    %98 = vector.extract_strided_slice %95 {offsets = [1, 0], sizes = [1, 2], strides = [1, 1]} : vector<3x2xf32> to vector<1x2xf32>
    %99 = arith.mulf %98, %78 : vector<1x2xf32>
    %100 = vector.extract_strided_slice %95 {offsets = [0, 0], sizes = [1, 2], strides = [1, 1]} : vector<3x2xf32> to vector<1x2xf32>
    %101 = arith.mulf %100, %97 : vector<1x2xf32>
    %102 = arith.addf %99, %101 : vector<1x2xf32>
    %103 = vector.extract_strided_slice %95 {offsets = [2, 0], sizes = [1, 2], strides = [1, 1]} : vector<3x2xf32> to vector<1x2xf32>
    %104 = math.tanh %102 : vector<1x2xf32>
    %105 = arith.mulf %103, %104 : vector<1x2xf32>
    %106 = arith.index_cast %c2_i32 : i32 to index
    %c0_30 = arith.constant 0 : index
    %107 = vector.load %arg3[%106, %c0_30] : memref<8x2xf32, #tpu.memory_space<vmem>>, vector<1x2xf32>
    tpu.vector_store %arg3[%106, %c0_30], %105 {strides = array<i32>} : memref<8x2xf32, #tpu.memory_space<vmem>>, vector<1x2xf32>,
    %c3_i32 = arith.constant 3 : i32
    %108 = arith.index_cast %c3_i32 : i32 to index
    %c0_31 = arith.constant 0 : index
    %c0_32 = arith.constant 0 : index
    %109 = vector.load %arg4[%108, %c0_31, %c0_32] : memref<8x4x2xf32, #tpu.memory_space<vmem>>, vector<1x4x2xf32>
    %110 = vector.shape_cast %109 : vector<1x4x2xf32> to vector<4x2xf32>
    %111 = vector.broadcast %105 : vector<1x2xf32> to vector<4x2xf32>
    %112 = arith.mulf %34, %111 : vector<4x2xf32>
    %113 = arith.addf %110, %112 : vector<4x2xf32>
    %114 = vector.extract_strided_slice %113 {offsets = [0, 0], sizes = [3, 2], strides = [1, 1]} : vector<4x2xf32> to vector<3x2xf32>
    %115 = arith.negf %114 : vector<3x2xf32>
    %116 = math.exp %115 : vector<3x2xf32>
    %cst_33 = arith.constant 1.000000e+00 : f32
    %117 = vector.broadcast %cst_33 : f32 to vector<3x2xf32>
    %118 = arith.addf %117, %116 : vector<3x2xf32>
    %119 = arith.divf %117, %118 : vector<3x2xf32>
    %120 = vector.extract_strided_slice %113 {offsets = [3, 0], sizes = [1, 2], strides = [1, 1]} : vector<4x2xf32> to vector<1x2xf32>
    %121 = math.tanh %120 : vector<1x2xf32>
    %122 = vector.extract_strided_slice %119 {offsets = [1, 0], sizes = [1, 2], strides = [1, 1]} : vector<3x2xf32> to vector<1x2xf32>
    %123 = arith.mulf %122, %102 : vector<1x2xf32>
    %124 = vector.extract_strided_slice %119 {offsets = [0, 0], sizes = [1, 2], strides = [1, 1]} : vector<3x2xf32> to vector<1x2xf32>
    %125 = arith.mulf %124, %121 : vector<1x2xf32>
    %126 = arith.addf %123, %125 : vector<1x2xf32>
    %127 = vector.extract_strided_slice %119 {offsets = [2, 0], sizes = [1, 2], strides = [1, 1]} : vector<3x2xf32> to vector<1x2xf32>
    %128 = math.tanh %126 : vector<1x2xf32>
    %129 = arith.mulf %127, %128 : vector<1x2xf32>
    %130 = arith.index_cast %c3_i32 : i32 to index
    %c0_34 = arith.constant 0 : index
    %131 = vector.load %arg3[%130, %c0_34] : memref<8x2xf32, #tpu.memory_space<vmem>>, vector<1x2xf32>
    tpu.vector_store %arg3[%130, %c0_34], %129 {strides = array<i32>} : memref<8x2xf32, #tpu.memory_space<vmem>>, vector<1x2xf32>,
    %c4_i32 = arith.constant 4 : i32
    %132 = arith.index_cast %c4_i32 : i32 to index
    %c0_35 = arith.constant 0 : index
    %c0_36 = arith.constant 0 : index
    %133 = vector.load %arg4[%132, %c0_35, %c0_36] : memref<8x4x2xf32, #tpu.memory_space<vmem>>, vector<1x4x2xf32>
    %134 = vector.shape_cast %133 : vector<1x4x2xf32> to vector<4x2xf32>
    %135 = vector.broadcast %129 : vector<1x2xf32> to vector<4x2xf32>
    %136 = arith.mulf %34, %135 : vector<4x2xf32>
    %137 = arith.addf %134, %136 : vector<4x2xf32>
    %138 = vector.extract_strided_slice %137 {offsets = [0, 0], sizes = [3, 2], strides = [1, 1]} : vector<4x2xf32> to vector<3x2xf32>
    %139 = arith.negf %138 : vector<3x2xf32>
    %140 = math.exp %139 : vector<3x2xf32>
    %cst_37 = arith.constant 1.000000e+00 : f32
    %141 = vector.broadcast %cst_37 : f32 to vector<3x2xf32>
    %142 = arith.addf %141, %140 : vector<3x2xf32>
    %143 = arith.divf %141, %142 : vector<3x2xf32>
    %144 = vector.extract_strided_slice %137 {offsets = [3, 0], sizes = [1, 2], strides = [1, 1]} : vector<4x2xf32> to vector<1x2xf32>
    %145 = math.tanh %144 : vector<1x2xf32>
    %146 = vector.extract_strided_slice %143 {offsets = [1, 0], sizes = [1, 2], strides = [1, 1]} : vector<3x2xf32> to vector<1x2xf32>
    %147 = arith.mulf %146, %126 : vector<1x2xf32>
    %148 = vector.extract_strided_slice %143 {offsets = [0, 0], sizes = [1, 2], strides = [1, 1]} : vector<3x2xf32> to vector<1x2xf32>
    %149 = arith.mulf %148, %145 : vector<1x2xf32>
    %150 = arith.addf %147, %149 : vector<1x2xf32>
    %151 = vector.extract_strided_slice %143 {offsets = [2, 0], sizes = [1, 2], strides = [1, 1]} : vector<3x2xf32> to vector<1x2xf32>
    %152 = math.tanh %150 : vector<1x2xf32>
    %153 = arith.mulf %151, %152 : vector<1x2xf32>
    %154 = arith.index_cast %c4_i32 : i32 to index
    %c0_38 = arith.constant 0 : index
    %155 = vector.load %arg3[%154, %c0_38] : memref<8x2xf32, #tpu.memory_space<vmem>>, vector<1x2xf32>
    tpu.vector_store %arg3[%154, %c0_38], %153 {strides = array<i32>} : memref<8x2xf32, #tpu.memory_space<vmem>>, vector<1x2xf32>,
    %c5_i32 = arith.constant 5 : i32
    %156 = arith.index_cast %c5_i32 : i32 to index
    %c0_39 = arith.constant 0 : index
    %c0_40 = arith.constant 0 : index
    %157 = vector.load %arg4[%156, %c0_39, %c0_40] : memref<8x4x2xf32, #tpu.memory_space<vmem>>, vector<1x4x2xf32>
    %158 = vector.shape_cast %157 : vector<1x4x2xf32> to vector<4x2xf32>
    %159 = vector.broadcast %153 : vector<1x2xf32> to vector<4x2xf32>
    %160 = arith.mulf %34, %159 : vector<4x2xf32>
    %161 = arith.addf %158, %160 : vector<4x2xf32>
    %162 = vector.extract_strided_slice %161 {offsets = [0, 0], sizes = [3, 2], strides = [1, 1]} : vector<4x2xf32> to vector<3x2xf32>
    %163 = arith.negf %162 : vector<3x2xf32>
    %164 = math.exp %163 : vector<3x2xf32>
    %cst_41 = arith.constant 1.000000e+00 : f32
    %165 = vector.broadcast %cst_41 : f32 to vector<3x2xf32>
    %166 = arith.addf %165, %164 : vector<3x2xf32>
    %167 = arith.divf %165, %166 : vector<3x2xf32>
    %168 = vector.extract_strided_slice %161 {offsets = [3, 0], sizes = [1, 2], strides = [1, 1]} : vector<4x2xf32> to vector<1x2xf32>
    %169 = math.tanh %168 : vector<1x2xf32>
    %170 = vector.extract_strided_slice %167 {offsets = [1, 0], sizes = [1, 2], strides = [1, 1]} : vector<3x2xf32> to vector<1x2xf32>
    %171 = arith.mulf %170, %150 : vector<1x2xf32>
    %172 = vector.extract_strided_slice %167 {offsets = [0, 0], sizes = [1, 2], strides = [1, 1]} : vector<3x2xf32> to vector<1x2xf32>
    %173 = arith.mulf %172, %169 : vector<1x2xf32>
    %174 = arith.addf %171, %173 : vector<1x2xf32>
    %175 = vector.extract_strided_slice %167 {offsets = [2, 0], sizes = [1, 2], strides = [1, 1]} : vector<3x2xf32> to vector<1x2xf32>
    %176 = math.tanh %174 : vector<1x2xf32>
    %177 = arith.mulf %175, %176 : vector<1x2xf32>
    %178 = arith.index_cast %c5_i32 : i32 to index
    %c0_42 = arith.constant 0 : index
    %179 = vector.load %arg3[%178, %c0_42] : memref<8x2xf32, #tpu.memory_space<vmem>>, vector<1x2xf32>
    tpu.vector_store %arg3[%178, %c0_42], %177 {strides = array<i32>} : memref<8x2xf32, #tpu.memory_space<vmem>>, vector<1x2xf32>,
    %c6_i32 = arith.constant 6 : i32
    %180 = arith.index_cast %c6_i32 : i32 to index
    %c0_43 = arith.constant 0 : index
    %c0_44 = arith.constant 0 : index
    %181 = vector.load %arg4[%180, %c0_43, %c0_44] : memref<8x4x2xf32, #tpu.memory_space<vmem>>, vector<1x4x2xf32>
    %182 = vector.shape_cast %181 : vector<1x4x2xf32> to vector<4x2xf32>
    %183 = vector.broadcast %177 : vector<1x2xf32> to vector<4x2xf32>
    %184 = arith.mulf %34, %183 : vector<4x2xf32>
    %185 = arith.addf %182, %184 : vector<4x2xf32>
    %186 = vector.extract_strided_slice %185 {offsets = [0, 0], sizes = [3, 2], strides = [1, 1]} : vector<4x2xf32> to vector<3x2xf32>
    %187 = arith.negf %186 : vector<3x2xf32>
    %188 = math.exp %187 : vector<3x2xf32>
    %cst_45 = arith.constant 1.000000e+00 : f32
    %189 = vector.broadcast %cst_45 : f32 to vector<3x2xf32>
    %190 = arith.addf %189, %188 : vector<3x2xf32>
    %191 = arith.divf %189, %190 : vector<3x2xf32>
    %192 = vector.extract_strided_slice %185 {offsets = [3, 0], sizes = [1, 2], strides = [1, 1]} : vector<4x2xf32> to vector<1x2xf32>
    %193 = math.tanh %192 : vector<1x2xf32>
    %194 = vector.extract_strided_slice %191 {offsets = [1, 0], sizes = [1, 2], strides = [1, 1]} : vector<3x2xf32> to vector<1x2xf32>
    %195 = arith.mulf %194, %174 : vector<1x2xf32>
    %196 = vector.extract_strided_slice %191 {offsets = [0, 0], sizes = [1, 2], strides = [1, 1]} : vector<3x2xf32> to vector<1x2xf32>
    %197 = arith.mulf %196, %193 : vector<1x2xf32>
    %198 = arith.addf %195, %197 : vector<1x2xf32>
    %199 = vector.extract_strided_slice %191 {offsets = [2, 0], sizes = [1, 2], strides = [1, 1]} : vector<3x2xf32> to vector<1x2xf32>
    %200 = math.tanh %198 : vector<1x2xf32>
    %201 = arith.mulf %199, %200 : vector<1x2xf32>
    %202 = arith.index_cast %c6_i32 : i32 to index
    %c0_46 = arith.constant 0 : index
    %203 = vector.load %arg3[%202, %c0_46] : memref<8x2xf32, #tpu.memory_space<vmem>>, vector<1x2xf32>
    tpu.vector_store %arg3[%202, %c0_46], %201 {strides = array<i32>} : memref<8x2xf32, #tpu.memory_space<vmem>>, vector<1x2xf32>,
    %c7_i32 = arith.constant 7 : i32
    %204 = arith.index_cast %c7_i32 : i32 to index
    %c0_47 = arith.constant 0 : index
    %c0_48 = arith.constant 0 : index
    %205 = vector.load %arg4[%204, %c0_47, %c0_48] : memref<8x4x2xf32, #tpu.memory_space<vmem>>, vector<1x4x2xf32>
    %206 = vector.shape_cast %205 : vector<1x4x2xf32> to vector<4x2xf32>
    %207 = vector.broadcast %201 : vector<1x2xf32> to vector<4x2xf32>
    %208 = arith.mulf %34, %207 : vector<4x2xf32>
    %209 = arith.addf %206, %208 : vector<4x2xf32>
    %210 = vector.extract_strided_slice %209 {offsets = [0, 0], sizes = [3, 2], strides = [1, 1]} : vector<4x2xf32> to vector<3x2xf32>
    %211 = arith.negf %210 : vector<3x2xf32>
    %212 = math.exp %211 : vector<3x2xf32>
    %cst_49 = arith.constant 1.000000e+00 : f32
    %213 = vector.broadcast %cst_49 : f32 to vector<3x2xf32>
    %214 = arith.addf %213, %212 : vector<3x2xf32>
    %215 = arith.divf %213, %214 : vector<3x2xf32>
    %216 = vector.extract_strided_slice %209 {offsets = [3, 0], sizes = [1, 2], strides = [1, 1]} : vector<4x2xf32> to vector<1x2xf32>
    %217 = math.tanh %216 : vector<1x2xf32>
    %218 = vector.extract_strided_slice %215 {offsets = [1, 0], sizes = [1, 2], strides = [1, 1]} : vector<3x2xf32> to vector<1x2xf32>
    %219 = arith.mulf %218, %198 : vector<1x2xf32>
    %220 = vector.extract_strided_slice %215 {offsets = [0, 0], sizes = [1, 2], strides = [1, 1]} : vector<3x2xf32> to vector<1x2xf32>
    %221 = arith.mulf %220, %217 : vector<1x2xf32>
    %222 = arith.addf %219, %221 : vector<1x2xf32>
    %223 = vector.extract_strided_slice %215 {offsets = [2, 0], sizes = [1, 2], strides = [1, 1]} : vector<3x2xf32> to vector<1x2xf32>
    %224 = math.tanh %222 : vector<1x2xf32>
    %225 = arith.mulf %223, %224 : vector<1x2xf32>
    %226 = arith.index_cast %c7_i32 : i32 to index
    %c0_50 = arith.constant 0 : index
    %227 = vector.load %arg3[%226, %c0_50] : memref<8x2xf32, #tpu.memory_space<vmem>>, vector<1x2xf32>
    tpu.vector_store %arg3[%226, %c0_50], %225 {strides = array<i32>} : memref<8x2xf32, #tpu.memory_space<vmem>>, vector<1x2xf32>,
    %c8_i32 = arith.constant 8 : i32
    return
  }
}

</mosaic_0001>

<bundles_post_ra>
// kernel: nn_forward.1
= control target key start
LH: loop header
LB: loop body
LE: loop exit
PB: predicated region body
PF: predicated region fallthrough
CT: control target
= control target key end

     0   :  { %s4385_s16 = smov 120   ;;  %vm73_vm0 = vcmask 64512   ;;  %v4386_v28 = vmov 16   ;;  %v4387_v31 = vmov 0.0|0.0   ;;  %vm4388_vm1 = vmmov 0   ;;  %s5284_s1 = inlined_call_operand.vmem [shape: f32[80,17], index: 1, kind: input, shape index: {}]   ;;  %s5285_s0 = inlined_call_operand.vmem [shape: f32[10,8,2], index: 0, kind: input, shape index: {}]   ;;  %s5286_s2 = inlined_call_operand.vmem [shape: f32[4,42], index: 2, kind: input, shape index: {}]   ;;  %s5287_s3 = inlined_call_operand.vmem [shape: f32[8,2], index: 3, kind: output, shape index: {}]  }
   0x1   :  { %v4415_v0 = vld [vmem:[%s5284_s1] sm:$0xff]  ;;  %v4420_v1 = vld [vmem:[%s5284_s1 + $0x10] sm:$0xff]  ;;  %v4427_v2 = vld [vmem:[%s5284_s1 + $0x8] sm:$0xff]  ;;  %4318 = vset.pattern.permute.xlu1 %v4386_v28  ;;  %4317 = vset.pattern.permute.xlu0 %v4386_v28  ;;  %v4389_v32 = vmov 0.0   ;;  %v4390_v45 = vmov 41   ;;  %v4391_v46 = vmov 40  }
   0x2   :  { %53 = vrot.lane.b32.xlu0 %v4415_v0, %s4385_s16  ;;  %57 = vrot.lane.b32.xlu1 %v4420_v1, %s4385_s16  ;;  %v4432_v3 = vld [vmem:[%s5284_s1 + $0x18] sm:$0xff]  ;;  %v4437_v4 = vld [vmem:[%s5285_s0 + $0x8] sm:$0xff]  ;;  %vm2495_vm2 = vcmask 326656   ;;  %vm3058_vm3 = vcmask 11264   ;;  %vm3095_vm4 = vcmask 10242  }
   0x3   :  { %3762 = vmatprep.subr.mxu0 %v4437_v4  ;;  %v4443_v5 = vld [vmem:[%s5285_s0 + $0x10] sm:$0xff]  ;;  %v4448_v6 = vld [vmem:[%s5285_s0 + $0x18] sm:$0xff]  ;;  %v4455_v7 = vld [vmem:[%s5284_s1 + $0x20] sm:$0xff] }
   0x4   :  { %v4460_v8 = vld [vmem:[%s5284_s1 + $0x28] sm:$0xff]  ;;  %3779 = vmatprep.subr.mxu1 %v4443_v5  ;;  %3763 = vmatpush3.msra.mxu0 %v4437_v4  ;;  %v4471_v9 = vld [vmem:[%s5285_s0 + $0x20] sm:$0xff]  ;;  %v4476_v10 = vld [vmem:[%s5284_s1 + $0x30] sm:$0xff] }
   0x5   :  { %3780 = vmatpush3.msra.mxu1 %v4443_v5  ;;  %3796 = vmatprep.subr.mxu0 %v4448_v6  ;;  %v4481_v11 = vld [vmem:[%s5284_s1 + $0x38] sm:$0xff]  ;;  %v4489_v12 = vld [vmem:[%s5284_s1 + $0x40] sm:$0xff]  ;;  %v4494_v13 = vld [vmem:[%s5284_s1 + $0x48] sm:$0xff] }
   0x6   :  { %55 = vrot.lane.b32.xlu0 %v4427_v2, %s4385_s16  ;;  %59 = vrot.lane.b32.xlu1 %v4432_v3, %s4385_s16  ;;  %v4517_v18 = vld [vmem:[%s5285_s0 + $0x28] sm:$0xff]  ;;  %v4522_v19 = vld [vmem:[%s5285_s0 + $0x30] sm:$0xff] }
   0x7   :  { %3813 = vmatprep.subr.mxu1 %v4471_v9  ;;  %v4583_v26 = vld [vmem:[%s5285_s0 + $0x38] sm:$0xff]  ;;  %v4588_v27 = vld [vmem:[%s5285_s0 + $0x40] sm:$0xff]  ;;  %v3319_v29 = vld [vmem:[%s5285_s0 + $0x48] sm:$0xff] }
   0x8   :  { %v24_v30 = vld [vmem:[%s5285_s0] sm:$0xff] }
   0x9   :  { %v4963_v44 = vld [vmem:[%s5286_s2] sm:$0xf] }
   0xa   :  { %61 = vrot.lane.b32.xlu0 %v4455_v7, %s4385_s16  ;;  %63 = vrot.lane.b32.xlu1 %v4460_v8, %s4385_s16 }
   0xe   :  { %65 = vrot.lane.b32.xlu0 %v4476_v10, %s4385_s16  ;;  %67 = vrot.lane.b32.xlu1 %v4481_v11, %s4385_s16 }
  0x12   :  { %69 = vrot.lane.b32.xlu0 %v4489_v12, %s4385_s16  ;;  %71 = vrot.lane.b32.xlu1 %v4494_v13, %s4385_s16 }
  0x16   :  { %2189 = vperm.xlu1 %4318, %v4427_v2   ;;  %2185 = vperm.xlu0 %4317, %v4415_v0  }
  0x1a   :  { %2205 = vperm.xlu1 %4318, %v4460_v8   ;;  %2209 = vperm.xlu0 %4317, %v4476_v10  }
  0x1e   :  { %2193 = vperm.xlu1 %4318, %v4420_v1   ;;  %2197 = vperm.xlu0 %4317, %v4432_v3  }
  0x22   :  { %2213 = vperm.xlu1 %4318, %v4481_v11   ;;  %2217 = vperm.xlu0 %4317, %v4489_v12  }
  0x26   :  { %2201 = vperm.xlu1 %4318, %v4455_v7   ;;  %2221 = vperm.xlu0 %4317, %v4494_v13  }
  0x2a   :  { %4319 = vset.pattern.permute.xlu1 %v4390_v45  ;;  %4320 = vset.pattern.permute.xlu0 %v4391_v46 }
  0x2b   :  { %2492 = vperm.xlu1 %4319, %v4963_v44   ;;  %3068 = vperm.xlu0 %4320, %v4963_v44  }
  0x74   :  { %v4498_v14 = vpop.permute.xlu0 %53  ;;  %v4500_v15 = vpop.permute.xlu1 %57 }
  0x75   :  { %3764 = vmatprep.mubr.msk.f32.mxu0 %vm73_vm0, %v4498_v14  ;;  %3781 = vmatprep.mubr.msk.f32.mxu1 %vm73_vm0, %v4498_v14 }
  0x78   :  { %v4506_v16 = vpop.permute.xlu0 %55  ;;  %v4508_v17 = vpop.permute.xlu1 %59 }
  0x79   :  { %3765 = vmatmul.mubr.msk.f32.vlgmr.msra.gmra.mrb[0].mxu0 %vm73_vm0, %v4506_v16  ;;  %3782 = vmatmul.mubr.msk.f32.vlgmr.msra.gmra.mrb[0].mxu1 %vm73_vm0, %v4506_v16 }
  0x7a   :  { %3767 = vmatprep.mubr.msk.f32.mxu0 %vm73_vm0, %v4500_v15  ;;  %3784 = vmatprep.mubr.msk.f32.mxu1 %vm73_vm0, %v4500_v15 }
  0x7b   :  { %3797 = vmatpush3.msra.mxu0 %v4448_v6  ;;  %3814 = vmatpush3.msra.mxu1 %v4471_v9 }
  0x7c   :  { %v4530_v20 = vpop.permute.xlu0 %61  ;;  %v4532_v21 = vpop.permute.xlu1 %63  ;;  %3830 = vmatprep.subr.mxu0 %v4517_v18  ;;  %3847 = vmatprep.subr.mxu1 %v4522_v19 }
  0x7d   :  { %3768 = vmatmul.mubr.msk.f32.gmra.mrb[2].mxu0 %vm73_vm0, %v4508_v17  ;;  %3785 = vmatmul.mubr.msk.f32.gmra.mrb[2].mxu1 %vm73_vm0, %v4508_v17 }
  0x7e   :  { %3770 = vmatprep.mubr.msk.f32.mxu0 %vm73_vm0, %v4530_v20  ;;  %3787 = vmatprep.mubr.msk.f32.mxu1 %vm73_vm0, %v4530_v20 }
  0x80   :  { %v4544_v22 = vpop.permute.xlu0 %65  ;;  %v4546_v23 = vpop.permute.xlu1 %67 }
  0x81   :  { %3771 = vmatmul.mubr.msk.f32.gmra.mrb[4].mxu0 %vm73_vm0, %v4532_v21  ;;  %3788 = vmatmul.mubr.msk.f32.gmra.mrb[4].mxu1 %vm73_vm0, %v4532_v21 }
  0x82   :  { %3773 = vmatprep.mubr.msk.f32.mxu0 %vm73_vm0, %v4544_v22  ;;  %3790 = vmatprep.mubr.msk.f32.mxu1 %vm73_vm0, %v4544_v22 }
  0x84   :  { %v4556_v24 = vpop.permute.xlu0 %69  ;;  %v4562_v25 = vpop.permute.xlu1 %71 }
  0x85   :  { %3774 = vmatmul.mubr.msk.f32.gmra.mrb[6].mxu0 %vm73_vm0, %v4546_v23  ;;  %3791 = vmatmul.mubr.msk.f32.gmra.mrb[6].mxu1 %vm73_vm0, %v4546_v23 }
  0x86   :  { %3776 = vmatprep.mubr.msk.f32.mxu0 %vm73_vm0, %v4556_v24  ;;  %3793 = vmatprep.mubr.msk.f32.mxu1 %vm73_vm0, %v4556_v24 }
  0x89   :  { %3777 = vmatmul.mubr.msk.f32.gmra.mrb[8].mxu0 %vm73_vm0, %v4562_v25  ;;  %3794 = vmatmul.mubr.msk.f32.gmra.mrb[8].mxu1 %vm73_vm0, %v4562_v25 }
  0x8a   :  { %3798 = vmatprep.mubr.msk.f32.mxu0 %vm73_vm0, %v4498_v14  ;;  %3815 = vmatprep.mubr.msk.f32.mxu1 %vm73_vm0, %v4498_v14 }
  0x8d   :  { %3799 = vmatmul.mubr.msk.f32.vlgmr.msra.gmra.mrb[10].mxu0 %vm73_vm0, %v4506_v16  ;;  %3816 = vmatmul.mubr.msk.f32.vlgmr.msra.gmra.mrb[10].mxu1 %vm73_vm0, %v4506_v16 }
  0x8e   :  { %3801 = vmatprep.mubr.msk.f32.mxu0 %vm73_vm0, %v4500_v15  ;;  %3818 = vmatprep.mubr.msk.f32.mxu1 %vm73_vm0, %v4500_v15 }
  0x8f   :  { %3831 = vmatpush3.msra.mxu0 %v4517_v18  ;;  %3848 = vmatpush3.msra.mxu1 %v4522_v19 }
  0x90   :  { %3864 = vmatprep.subr.mxu0 %v4583_v26  ;;  %3881 = vmatprep.subr.mxu1 %v4588_v27 }
  0x91   :  { %3802 = vmatmul.mubr.msk.f32.gmra.mrb[12].mxu0 %vm73_vm0, %v4508_v17  ;;  %3819 = vmatmul.mubr.msk.f32.gmra.mrb[12].mxu1 %vm73_vm0, %v4508_v17 }
  0x92   :  { %3804 = vmatprep.mubr.msk.f32.mxu0 %vm73_vm0, %v4530_v20  ;;  %3821 = vmatprep.mubr.msk.f32.mxu1 %vm73_vm0, %v4530_v20 }
  0x95   :  { %3805 = vmatmul.mubr.msk.f32.gmra.mrb[14].mxu0 %vm73_vm0, %v4532_v21  ;;  %3822 = vmatmul.mubr.msk.f32.gmra.mrb[14].mxu1 %vm73_vm0, %v4532_v21  ;;  %v4946_v33 = vpop.permute.xlu1 %2189  ;;  %v4948_v34 = vpop.permute.xlu0 %2185 }
  0x96   :  { %3807 = vmatprep.mubr.msk.f32.mxu0 %vm73_vm0, %v4544_v22  ;;  %3824 = vmatprep.mubr.msk.f32.mxu1 %vm73_vm0, %v4544_v22 }
  0x99   :  { %3808 = vmatmul.mubr.msk.f32.gmra.mrb[16].mxu0 %vm73_vm0, %v4546_v23  ;;  %3825 = vmatmul.mubr.msk.f32.gmra.mrb[16].mxu1 %vm73_vm0, %v4546_v23  ;;  %v4950_v35 = vpop.permute.xlu1 %2205  ;;  %v4952_v36 = vpop.permute.xlu0 %2209 }
  0x9a   :  { %3810 = vmatprep.mubr.msk.f32.mxu0 %vm73_vm0, %v4556_v24  ;;  %3827 = vmatprep.mubr.msk.f32.mxu1 %vm73_vm0, %v4556_v24 }
  0x9d   :  { %3811 = vmatmul.mubr.msk.f32.gmra.mrb[18].mxu0 %vm73_vm0, %v4562_v25  ;;  %3828 = vmatmul.mubr.msk.f32.gmra.mrb[18].mxu1 %vm73_vm0, %v4562_v25  ;;  %v4954_v38 = vpop.permute.xlu1 %2193  ;;  %v4956_v40 = vpop.permute.xlu0 %2197 }
  0x9e   :  { %3832 = vmatprep.mubr.msk.f32.mxu0 %vm73_vm0, %v4498_v14  ;;  %3849 = vmatprep.mubr.msk.f32.mxu1 %vm73_vm0, %v4498_v14 }
  0xa1   :  { %3833 = vmatmul.mubr.msk.f32.vlgmr.msra.gmra.mrb[20].mxu0 %vm73_vm0, %v4506_v16  ;;  %3850 = vmatmul.mubr.msk.f32.vlgmr.msra.gmra.mrb[20].mxu1 %vm73_vm0, %v4506_v16  ;;  %v4958_v43 = vpop.permute.xlu1 %2213  ;;  %v4968_v49 = vpop.permute.xlu0 %2217 }
  0xa2   :  { %3835 = vmatprep.mubr.msk.f32.mxu0 %vm73_vm0, %v4500_v15  ;;  %3852 = vmatprep.mubr.msk.f32.mxu1 %vm73_vm0, %v4500_v15 }
  0xa3   :  { %3865 = vmatpush3.msra.mxu0 %v4583_v26  ;;  %3882 = vmatpush3.msra.mxu1 %v4588_v27 }
  0xa4   :  { %3898 = vmatprep.subr.mxu0 %v3319_v29  ;;  %3932 = vmatprep.subr.mxu1 %v4437_v4 }
  0xa5   :  { %3836 = vmatmul.mubr.msk.f32.gmra.mrb[22].mxu0 %vm73_vm0, %v4508_v17  ;;  %3853 = vmatmul.mubr.msk.f32.gmra.mrb[22].mxu1 %vm73_vm0, %v4508_v17  ;;  %v4973_v56 = vpop.permute.xlu1 %2201  ;;  %v4979_v62 = vpop.permute.xlu0 %2221 }
  0xa6   :  { %3838 = vmatprep.mubr.msk.f32.mxu0 %vm73_vm0, %v4530_v20  ;;  %3855 = vmatprep.mubr.msk.f32.mxu1 %vm73_vm0, %v4530_v20 }
  0xa9   :  { %3839 = vmatmul.mubr.msk.f32.gmra.mrb[24].mxu0 %vm73_vm0, %v4532_v21  ;;  %3856 = vmatmul.mubr.msk.f32.gmra.mrb[24].mxu1 %vm73_vm0, %v4532_v21 }
  0xaa   :  { %3841 = vmatprep.mubr.msk.f32.mxu0 %vm73_vm0, %v4544_v22  ;;  %3858 = vmatprep.mubr.msk.f32.mxu1 %vm73_vm0, %v4544_v22 }
  0xad   :  { %3842 = vmatmul.mubr.msk.f32.gmra.mrb[26].mxu0 %vm73_vm0, %v4546_v23  ;;  %3859 = vmatmul.mubr.msk.f32.gmra.mrb[26].mxu1 %vm73_vm0, %v4546_v23 }
  0xae   :  { %3844 = vmatprep.mubr.msk.f32.mxu0 %vm73_vm0, %v4556_v24  ;;  %3861 = vmatprep.mubr.msk.f32.mxu1 %vm73_vm0, %v4556_v24 }
  0xb1   :  { %3845 = vmatmul.mubr.msk.f32.gmra.mrb[28].mxu0 %vm73_vm0, %v4562_v25  ;;  %3862 = vmatmul.mubr.msk.f32.gmra.mrb[28].mxu1 %vm73_vm0, %v4562_v25 }
  0xb2   :  { %3866 = vmatprep.mubr.msk.f32.mxu0 %vm73_vm0, %v4498_v14  ;;  %3883 = vmatprep.mubr.msk.f32.mxu1 %vm73_vm0, %v4498_v14 }
  0xb5   :  { %3867 = vmatmul.mubr.msk.f32.vlgmr.msra.gmra.mrb[30].mxu0 %vm73_vm0, %v4506_v16  ;;  %3884 = vmatmul.mubr.msk.f32.vlgmr.msra.gmra.mrb[30].mxu1 %vm73_vm0, %v4506_v16 }
  0xb6   :  { %3869 = vmatprep.mubr.msk.f32.mxu0 %vm73_vm0, %v4500_v15  ;;  %3886 = vmatprep.mubr.msk.f32.mxu1 %vm73_vm0, %v4500_v15 }
  0xb7   :  { %3899 = vmatpush3.msra.mxu0 %v3319_v29  ;;  %3933 = vmatpush3.msra.mxu1 %v4437_v4 }
  0xb8   :  { %3915 = vmatprep.subr.mxu0 %v24_v30  ;;  %3966 = vmatprep.subr.mxu1 %v4448_v6 }
  0xb9   :  { %3870 = vmatmul.mubr.msk.f32.gmra.mrb[32].mxu0 %vm73_vm0, %v4508_v17  ;;  %3887 = vmatmul.mubr.msk.f32.gmra.mrb[32].mxu1 %vm73_vm0, %v4508_v17 }
  0xba   :  { %3872 = vmatprep.mubr.msk.f32.mxu0 %vm73_vm0, %v4530_v20  ;;  %3889 = vmatprep.mubr.msk.f32.mxu1 %vm73_vm0, %v4530_v20 }
  0xbd   :  { %3873 = vmatmul.mubr.msk.f32.gmra.mrb[34].mxu0 %vm73_vm0, %v4532_v21  ;;  %3890 = vmatmul.mubr.msk.f32.gmra.mrb[34].mxu1 %vm73_vm0, %v4532_v21 }
  0xbe   :  { %3875 = vmatprep.mubr.msk.f32.mxu0 %vm73_vm0, %v4544_v22  ;;  %3892 = vmatprep.mubr.msk.f32.mxu1 %vm73_vm0, %v4544_v22 }
  0xc1   :  { %3876 = vmatmul.mubr.msk.f32.gmra.mrb[36].mxu0 %vm73_vm0, %v4546_v23  ;;  %3893 = vmatmul.mubr.msk.f32.gmra.mrb[36].mxu1 %vm73_vm0, %v4546_v23 }
  0xc2   :  { %3878 = vmatprep.mubr.msk.f32.mxu0 %vm73_vm0, %v4556_v24  ;;  %3895 = vmatprep.mubr.msk.f32.mxu1 %vm73_vm0, %v4556_v24 }
  0xc5   :  { %3879 = vmatmul.mubr.msk.f32.gmra.mrb[38].mxu0 %vm73_vm0, %v4562_v25  ;;  %3896 = vmatmul.mubr.msk.f32.gmra.mrb[38].mxu1 %vm73_vm0, %v4562_v25 }
  0xc6   :  { %3900 = vmatprep.mubr.msk.f32.mxu0 %vm73_vm0, %v4498_v14  ;;  %3934 = vmatprep.mubr.msk.f32.mxu1 %vm73_vm0, %v4415_v0 }
  0xc9   :  { %3901 = vmatmul.mubr.msk.f32.vlgmr.msra.gmra.mrb[40].mxu0 %vm73_vm0, %v4506_v16  ;;  %3935 = vmatmul.mubr.msk.f32.vlgmr.msra.gmra.mrb[0].mxu1 %vm73_vm0, %v4427_v2 }
  0xca   :  { %3903 = vmatprep.mubr.msk.f32.mxu0 %vm73_vm0, %v4500_v15  ;;  %3937 = vmatprep.mubr.msk.f32.mxu1 %vm73_vm0, %v4420_v1 }
  0xcb   :  { %3916 = vmatpush3.msra.mxu0 %v24_v30  ;;  %3967 = vmatpush3.msra.mxu1 %v4448_v6 }
  0xcc   :  { %3949 = vmatprep.subr.mxu0 %v4443_v5  ;;  %4000 = vmatprep.subr.mxu1 %v4517_v18 }
  0xcd   :  { %3904 = vmatmul.mubr.msk.f32.gmra.mrb[42].mxu0 %vm73_vm0, %v4508_v17  ;;  %3938 = vmatmul.mubr.msk.f32.gmra.mrb[2].mxu1 %vm73_vm0, %v4432_v3 }
  0xce   :  { %3906 = vmatprep.mubr.msk.f32.mxu0 %vm73_vm0, %v4530_v20  ;;  %3940 = vmatprep.mubr.msk.f32.mxu1 %vm73_vm0, %v4455_v7 }
  0xd1   :  { %3907 = vmatmul.mubr.msk.f32.gmra.mrb[44].mxu0 %vm73_vm0, %v4532_v21  ;;  %3941 = vmatmul.mubr.msk.f32.gmra.mrb[4].mxu1 %vm73_vm0, %v4460_v8 }
  0xd2   :  { %3909 = vmatprep.mubr.msk.f32.mxu0 %vm73_vm0, %v4544_v22  ;;  %3943 = vmatprep.mubr.msk.f32.mxu1 %vm73_vm0, %v4476_v10 }
  0xd5   :  { %3910 = vmatmul.mubr.msk.f32.gmra.mrb[46].mxu0 %vm73_vm0, %v4546_v23  ;;  %3944 = vmatmul.mubr.msk.f32.gmra.mrb[6].mxu1 %vm73_vm0, %v4481_v11 }
  0xd6   :  { %3912 = vmatprep.mubr.msk.f32.mxu0 %vm73_vm0, %v4556_v24  ;;  %3946 = vmatprep.mubr.msk.f32.mxu1 %vm73_vm0, %v4489_v12 }
  0xd9   :  { %3913 = vmatmul.mubr.msk.f32.gmra.mrb[48].mxu0 %vm73_vm0, %v4562_v25  ;;  %3947 = vmatmul.mubr.msk.f32.gmra.mrb[8].mxu1 %vm73_vm0, %v4494_v13 }
  0xda   :  { %3917 = vmatprep.mubr.msk.f32.mxu0 %vm73_vm0, %v4415_v0  ;;  %3968 = vmatprep.mubr.msk.f32.mxu1 %vm73_vm0, %v4415_v0 }
  0xdd   :  { %3918 = vmatmul.mubr.msk.f32.vlgmr.msra.gmra.mrb[0].mxu0 %vm73_vm0, %v4427_v2  ;;  %3969 = vmatmul.mubr.msk.f32.vlgmr.msra.gmra.mrb[10].mxu1 %vm73_vm0, %v4427_v2 }
  0xde   :  { %3920 = vmatprep.mubr.msk.f32.mxu0 %vm73_vm0, %v4420_v1  ;;  %3971 = vmatprep.mubr.msk.f32.mxu1 %vm73_vm0, %v4420_v1 }
  0xdf   :  { %3950 = vmatpush3.msra.mxu0 %v4443_v5  ;;  %4001 = vmatpush3.msra.mxu1 %v4517_v18 }
  0xe0   :  { %3983 = vmatprep.subr.mxu0 %v4471_v9  ;;  %4034 = vmatprep.subr.mxu1 %v4583_v26 }
  0xe1   :  { %3921 = vmatmul.mubr.msk.f32.gmra.mrb[2].mxu0 %vm73_vm0, %v4432_v3  ;;  %3972 = vmatmul.mubr.msk.f32.gmra.mrb[12].mxu1 %vm73_vm0, %v4432_v3 }
  0xe2   :  { %3923 = vmatprep.mubr.msk.f32.mxu0 %vm73_vm0, %v4455_v7  ;;  %3974 = vmatprep.mubr.msk.f32.mxu1 %vm73_vm0, %v4455_v7 }
  0xe5   :  { %3924 = vmatmul.mubr.msk.f32.gmra.mrb[4].mxu0 %vm73_vm0, %v4460_v8  ;;  %3975 = vmatmul.mubr.msk.f32.gmra.mrb[14].mxu1 %vm73_vm0, %v4460_v8 }
  0xe6   :  { %3926 = vmatprep.mubr.msk.f32.mxu0 %vm73_vm0, %v4476_v10  ;;  %3977 = vmatprep.mubr.msk.f32.mxu1 %vm73_vm0, %v4476_v10 }
  0xe9   :  { %3927 = vmatmul.mubr.msk.f32.gmra.mrb[6].mxu0 %vm73_vm0, %v4481_v11  ;;  %3978 = vmatmul.mubr.msk.f32.gmra.mrb[16].mxu1 %vm73_vm0, %v4481_v11 }
  0xea   :  { %3929 = vmatprep.mubr.msk.f32.mxu0 %vm73_vm0, %v4489_v12  ;;  %3980 = vmatprep.mubr.msk.f32.mxu1 %vm73_vm0, %v4489_v12 }
  0xed   :  { %3930 = vmatmul.mubr.msk.f32.gmra.mrb[8].mxu0 %vm73_vm0, %v4494_v13  ;;  %3981 = vmatmul.mubr.msk.f32.gmra.mrb[18].mxu1 %vm73_vm0, %v4494_v13 }
  0xee   :  { %3951 = vmatprep.mubr.msk.f32.mxu0 %vm73_vm0, %v4415_v0  ;;  %4002 = vmatprep.mubr.msk.f32.mxu1 %vm73_vm0, %v4415_v0 }
  0xf1   :  { %3952 = vmatmul.mubr.msk.f32.vlgmr.msra.gmra.mrb[10].mxu0 %vm73_vm0, %v4427_v2  ;;  %4003 = vmatmul.mubr.msk.f32.vlgmr.msra.gmra.mrb[20].mxu1 %vm73_vm0, %v4427_v2 }
  0xf2   :  { %3954 = vmatprep.mubr.msk.f32.mxu0 %vm73_vm0, %v4420_v1  ;;  %4005 = vmatprep.mubr.msk.f32.mxu1 %vm73_vm0, %v4420_v1 }
  0xf3   :  { %3984 = vmatpush3.msra.mxu0 %v4471_v9  ;;  %4035 = vmatpush3.msra.mxu1 %v4583_v26 }
  0xf4   :  { %4017 = vmatprep.subr.mxu0 %v4522_v19  ;;  %4172 = vmatprep.subr.bf16.mxu1 %v4387_v31 }
  0xf5   :  { %3955 = vmatmul.mubr.msk.f32.gmra.mrb[12].mxu0 %vm73_vm0, %v4432_v3  ;;  %4006 = vmatmul.mubr.msk.f32.gmra.mrb[22].mxu1 %vm73_vm0, %v4432_v3 }
  0xf6   :  { %3957 = vmatprep.mubr.msk.f32.mxu0 %vm73_vm0, %v4455_v7  ;;  %4008 = vmatprep.mubr.msk.f32.mxu1 %vm73_vm0, %v4455_v7 }
  0xf9   :  { %3958 = vmatmul.mubr.msk.f32.gmra.mrb[14].mxu0 %vm73_vm0, %v4460_v8  ;;  %4009 = vmatmul.mubr.msk.f32.gmra.mrb[24].mxu1 %vm73_vm0, %v4460_v8 }
  0xfa   :  { %3960 = vmatprep.mubr.msk.f32.mxu0 %vm73_vm0, %v4476_v10  ;;  %4011 = vmatprep.mubr.msk.f32.mxu1 %vm73_vm0, %v4476_v10 }
  0xfd   :  { %3961 = vmatmul.mubr.msk.f32.gmra.mrb[16].mxu0 %vm73_vm0, %v4481_v11  ;;  %4012 = vmatmul.mubr.msk.f32.gmra.mrb[26].mxu1 %vm73_vm0, %v4481_v11 }
  0xfe   :  { %3963 = vmatprep.mubr.msk.f32.mxu0 %vm73_vm0, %v4489_v12  ;;  %4014 = vmatprep.mubr.msk.f32.mxu1 %vm73_vm0, %v4489_v12 }
 0x101   :  { %3964 = vmatmul.mubr.msk.f32.gmra.mrb[18].mxu0 %vm73_vm0, %v4494_v13  ;;  %4015 = vmatmul.mubr.msk.f32.gmra.mrb[28].mxu1 %vm73_vm0, %v4494_v13 }
 0x102   :  { %3985 = vmatprep.mubr.msk.f32.mxu0 %vm73_vm0, %v4415_v0  ;;  %4036 = vmatprep.mubr.msk.f32.mxu1 %vm73_vm0, %v4415_v0 }
 0x105   :  { %3986 = vmatmul.mubr.msk.f32.vlgmr.msra.gmra.mrb[20].mxu0 %vm73_vm0, %v4427_v2  ;;  %4037 = vmatmul.mubr.msk.f32.vlgmr.msra.gmra.mrb[30].mxu1 %vm73_vm0, %v4427_v2 }
 0x106   :  { %3988 = vmatprep.mubr.msk.f32.mxu0 %vm73_vm0, %v4420_v1  ;;  %4039 = vmatprep.mubr.msk.f32.mxu1 %vm73_vm0, %v4420_v1 }
 0x107   :  { %4018 = vmatpush3.msra.mxu0 %v4522_v19 }
 0x108   :  { %4051 = vmatprep.subr.mxu0 %v4588_v27 }
 0x109   :  { %3989 = vmatmul.mubr.msk.f32.gmra.mrb[22].mxu0 %vm73_vm0, %v4432_v3  ;;  %4040 = vmatmul.mubr.msk.f32.gmra.mrb[32].mxu1 %vm73_vm0, %v4432_v3 }
 0x10a   :  { %3991 = vmatprep.mubr.msk.f32.mxu0 %vm73_vm0, %v4455_v7  ;;  %4042 = vmatprep.mubr.msk.f32.mxu1 %vm73_vm0, %v4455_v7 }
 0x10d   :  { %3992 = vmatmul.mubr.msk.f32.gmra.mrb[24].mxu0 %vm73_vm0, %v4460_v8  ;;  %4043 = vmatmul.mubr.msk.f32.gmra.mrb[34].mxu1 %vm73_vm0, %v4460_v8 }
 0x10e   :  { %3994 = vmatprep.mubr.msk.f32.mxu0 %vm73_vm0, %v4476_v10  ;;  %4045 = vmatprep.mubr.msk.f32.mxu1 %vm73_vm0, %v4476_v10 }
 0x111   :  { %3995 = vmatmul.mubr.msk.f32.gmra.mrb[26].mxu0 %vm73_vm0, %v4481_v11  ;;  %4046 = vmatmul.mubr.msk.f32.gmra.mrb[36].mxu1 %vm73_vm0, %v4481_v11 }
 0x112   :  { %3997 = vmatprep.mubr.msk.f32.mxu0 %vm73_vm0, %v4489_v12  ;;  %4048 = vmatprep.mubr.msk.f32.mxu1 %vm73_vm0, %v4489_v12 }
 0x115   :  { %3998 = vmatmul.mubr.msk.f32.gmra.mrb[28].mxu0 %vm73_vm0, %v4494_v13  ;;  %4049 = vmatmul.mubr.msk.f32.gmra.mrb[38].mxu1 %vm73_vm0, %v4494_v13 }
 0x116   :  { %4019 = vmatprep.mubr.msk.f32.mxu0 %vm73_vm0, %v4415_v0  ;;  %4078 = vmatprep.mubr.msk.f32.mxu1 %vm4388_vm1, %v4389_v32 }
 0x119   :  { %4020 = vmatmul.mubr.msk.f32.vlgmr.msra.gmra.mrb[30].mxu0 %vm73_vm0, %v4427_v2 }
 0x11a   :  { %4022 = vmatprep.mubr.msk.f32.mxu0 %vm73_vm0, %v4420_v1  ;;  %4052 = vmatpush3.msra.mxu0 %v4588_v27 }
 0x11b   :  { %4196 = vmatprep.subr.bf16.mxu0 %v4387_v31 }
 0x11d   :  { %4023 = vmatmul.mubr.msk.f32.gmra.mrb[32].mxu0 %vm73_vm0, %v4432_v3 }
 0x11e   :  { %4025 = vmatprep.mubr.msk.f32.mxu0 %vm73_vm0, %v4455_v7 }
 0x121   :  { %4026 = vmatmul.mubr.msk.f32.gmra.mrb[34].mxu0 %vm73_vm0, %v4460_v8 }
 0x122   :  { %4028 = vmatprep.mubr.msk.f32.mxu0 %vm73_vm0, %v4476_v10 }
 0x125   :  { %4029 = vmatmul.mubr.msk.f32.gmra.mrb[36].mxu0 %vm73_vm0, %v4481_v11 }
 0x126   :  { %4031 = vmatprep.mubr.msk.f32.mxu0 %vm73_vm0, %v4489_v12 }
 0x129   :  { %4032 = vmatmul.mubr.msk.f32.gmra.mrb[38].mxu0 %vm73_vm0, %v4494_v13 }
 0x12a   :  { %4053 = vmatprep.mubr.msk.f32.mxu0 %vm73_vm0, %v4415_v0 }
 0x12d   :  { %4054 = vmatmul.mubr.msk.f32.vlgmr.msra.gmra.mrb[40].mxu0 %vm73_vm0, %v4427_v2 }
 0x12e   :  { %4056 = vmatprep.mubr.msk.f32.mxu0 %vm73_vm0, %v4420_v1 }
 0x131   :  { %4057 = vmatmul.mubr.msk.f32.gmra.mrb[42].mxu0 %vm73_vm0, %v4432_v3 }
 0x132   :  { %4059 = vmatprep.mubr.msk.f32.mxu0 %vm73_vm0, %v4455_v7 }
 0x135   :  { %4060 = vmatmul.mubr.msk.f32.gmra.mrb[44].mxu0 %vm73_vm0, %v4460_v8 }
 0x136   :  { %4062 = vmatprep.mubr.msk.f32.mxu0 %vm73_vm0, %v4476_v10 }
 0x139   :  { %4063 = vmatmul.mubr.msk.f32.gmra.mrb[46].mxu0 %vm73_vm0, %v4481_v11 }
 0x13a   :  { %4065 = vmatprep.mubr.msk.f32.mxu0 %vm73_vm0, %v4489_v12 }
 0x13d   :  { %4066 = vmatmul.mubr.msk.f32.gmra.mrb[48].mxu0 %vm73_vm0, %v4494_v13 }
 0x13e   :  { %4130 = vmatprep.mubr.msk.f32.mxu0 %vm4388_vm1, %v4389_v32 }
 0x19c   :  { %v3936_v37 = vpop.f32.mrb[0].mxu1 }
 0x19d   :  { %v1330_v39 = vpop.f32.mrb[1].mxu1  ;;  %v2235_v55 = vadd.f32 %v3936_v37, %v4946_v33 }
 0x19e   :  { %v2234_v47 = vadd.f32 %v4948_v34, %v1330_v39 }
 0x19f   :  { %v2325_v2 = vmax.f32 %v2235_v55, 0.0 }
 0x1a0   :  { %v3939_v41 = vpop.f32.mrb[2].mxu1  ;;  %v2324_v52 = vmax.f32 %v2234_v47, 0.0 }
 0x1a1   :  { %v1340_v42 = vpop.f32.mrb[3].mxu1  ;;  %v2237_v3 = vadd.f32 %v3939_v41, %v4956_v40 }
 0x1a2   :  { %v2236_v53 = vadd.f32 %v4954_v38, %v1340_v42 }
 0x1a3   :  { %v2327_v13 = vmax.f32 %v2237_v3, 0.0 }
 0x1a4   :  { %v3942_v48 = vpop.f32.mrb[4].mxu1  ;;  %v2326_v63 = vmax.f32 %v2236_v53, 0.0 }
 0x1a5   :  { %v2239_v50 = vadd.f32 %v3942_v48, %v4950_v35  ;;  %v1350_v51 = vpop.f32.mrb[5].mxu1 }
 0x1a6   :  { %v2238_v0 = vadd.f32 %v4973_v56, %v1350_v51 }
 0x1a7   :  { %v2329_v54 = vmax.f32 %v2239_v50, 0.0 }
 0x1a8   :  { %v3945_v57 = vpop.f32.mrb[6].mxu1  ;;  %v2328_v11 = vmax.f32 %v2238_v0, 0.0 }
 0x1a9   :  { %v4975_v58 = vmax.f32 %v2324_v52, %v2329_v54  ;;  %v2241_v59 = vadd.f32 %v3945_v57, %v4958_v43  ;;  %v1360_v60 = vpop.f32.mrb[7].mxu1 }
 0x1aa   :  { %v2240_v61 = vadd.f32 %v4952_v36, %v1360_v60 }
 0x1ab   :  { %v2331_v1 = vmax.f32 %v2241_v59, 0.0 }
 0x1ac   :  { %v2330_v4 = vmax.f32 %v2240_v61, 0.0  ;;  %v3948_v5 = vpop.f32.mrb[8].mxu1 }
 0x1ad   :  { %v4983_v6 = vmax.f32 %v2326_v63, %v2331_v1  ;;  %v2243_v7 = vadd.f32 %v3948_v5, %v4979_v62  ;;  %v1370_v8 = vpop.f32.mrb[9].mxu1 }
 0x1ae   :  { %v4986_v9 = vmax.f32 %v2325_v2, %v2330_v4  ;;  %v2242_v10 = vadd.f32 %v4968_v49, %v1370_v8 }
 0x1af   :  { %v2333_v12 = vmax.f32 %v2243_v7, 0.0 }
 0x1b0   :  { %v2332_v14 = vmax.f32 %v2242_v10, 0.0  ;;  %v3919_v15 = vpop.f32.mrb[0].mxu0  ;;  %v3970_v16 = vpop.f32.mrb[10].mxu1 }
 0x1b1   :  { %v4989_v17 = vmax.f32 %v2328_v11, %v2333_v12  ;;  %v1215_v18 = vpop.f32.mrb[1].mxu0  ;;  %v1560_v19 = vpop.f32.mrb[11].mxu1  ;;  %v2225_v25 = vadd.f32 %v3919_v15, %v4946_v33  ;;  %v2255_v28 = vadd.f32 %v3970_v16, %v4946_v33 }
 0x1b2   :  { %v4991_v20 = vmax.f32 %v2327_v13, %v2332_v14  ;;  %v2224_v26 = vadd.f32 %v4948_v34, %v1215_v18  ;;  %v2254_v27 = vadd.f32 %v4948_v34, %v1560_v19 }
 0x1b3   :  { %v2315_v45 = vmax.f32 %v2225_v25, 0.0  ;;  %v2345_v53 = vmax.f32 %v2255_v28, 0.0 }
 0x1b4   :  { %v3922_v21 = vpop.f32.mrb[2].mxu0  ;;  %v3973_v22 = vpop.f32.mrb[12].mxu1  ;;  %v2314_v48 = vmax.f32 %v2224_v26, 0.0  ;;  %v2344_v50 = vmax.f32 %v2254_v27, 0.0 }
 0x1b5   :  { %v1225_v23 = vpop.f32.mrb[3].mxu0  ;;  %v1570_v24 = vpop.f32.mrb[13].mxu1  ;;  %v2227_v54 = vadd.f32 %v3922_v21, %v4956_v40  ;;  %v2257_v55 = vadd.f32 %v3973_v22, %v4956_v40 }
 0x1b6   :  { %v2226_v46 = vadd.f32 %v4954_v38, %v1225_v23  ;;  %v2256_v47 = vadd.f32 %v4954_v38, %v1570_v24 }
 0x1b7   :  { %v2317_v14 = vmax.f32 %v2227_v54, 0.0 }
 0x1b8   :  { %v3925_v29 = vpop.f32.mrb[4].mxu0  ;;  %v3976_v30 = vpop.f32.mrb[14].mxu1  ;;  %v2316_v4 = vmax.f32 %v2226_v46, 0.0  ;;  %v2346_v5 = vmax.f32 %v2256_v47, 0.0  ;;  %v2347_v47 = vmax.f32 %v2257_v55, 0.0 }
 0x1b9   :  { %v2229_v37 = vadd.f32 %v3925_v29, %v4950_v35  ;;  %v2259_v39 = vadd.f32 %v3976_v30, %v4950_v35  ;;  %v1235_v41 = vpop.f32.mrb[5].mxu0  ;;  %v1580_v42 = vpop.f32.mrb[15].mxu1 }
 0x1ba   :  { %v2228_v57 = vadd.f32 %v4973_v56, %v1235_v41  ;;  %v2258_v11 = vadd.f32 %v4973_v56, %v1580_v42 }
 0x1bb   :  { %v2319_v51 = vmax.f32 %v2229_v37, 0.0  ;;  %v2349_v52 = vmax.f32 %v2259_v39, 0.0 }
 0x1bc   :  { %v3928_v59 = vpop.f32.mrb[6].mxu0  ;;  %v3979_v60 = vpop.f32.mrb[16].mxu1  ;;  %v2318_v15 = vmax.f32 %v2228_v57, 0.0  ;;  %v2348_v39 = vmax.f32 %v2258_v11, 0.0 }
 0x1bd   :  { %v2404_v61 = vmax.f32 %v2314_v48, %v2319_v51  ;;  %v5004_v63 = vmax.f32 %v2344_v50, %v2349_v52  ;;  %v2231_v0 = vadd.f32 %v3928_v59, %v4958_v43  ;;  %v2261_v1 = vadd.f32 %v3979_v60, %v4958_v43  ;;  %v1245_v2 = vpop.f32.mrb[7].mxu0  ;;  %v1590_v3 = vpop.f32.mrb[17].mxu1 }
 0x1be   :  { %v2230_v7 = vadd.f32 %v4952_v36, %v1245_v2  ;;  %v2260_v8 = vadd.f32 %v4952_v36, %v1590_v3 }
 0x1bf   :  { %v2449_v10 = vmax.f32 %v2404_v61, %v4975_v58  ;;  %v2321_v12 = vmax.f32 %v2231_v0, 0.0  ;;  %v2351_v13 = vmax.f32 %v2261_v1, 0.0 }
 0x1c0   :  { %v2320_v16 = vmax.f32 %v2230_v7, 0.0  ;;  %v2350_v18 = vmax.f32 %v2260_v8, 0.0  ;;  %v3931_v19 = vpop.f32.mrb[8].mxu0  ;;  %v3982_v21 = vpop.f32.mrb[18].mxu1 }
 0x1c1   :  { %v2406_v22 = vmax.f32 %v2316_v4, %v2321_v12  ;;  %v5012_v23 = vmax.f32 %v2346_v5, %v2351_v13  ;;  %v2233_v24 = vadd.f32 %v3931_v19, %v4979_v62  ;;  %v2263_v25 = vadd.f32 %v3982_v21, %v4979_v62  ;;  %v1255_v26 = vpop.f32.mrb[9].mxu0  ;;  %v1600_v27 = vpop.f32.mrb[19].mxu1 }
 0x1c2   :  { %v2405_v28 = vmax.f32 %v2315_v45, %v2320_v16  ;;  %v5016_v29 = vmax.f32 %v2345_v53, %v2350_v18  ;;  %v2232_v30 = vadd.f32 %v4968_v49, %v1255_v26  ;;  %v2262_v37 = vadd.f32 %v4968_v49, %v1600_v27 }
 0x1c3   :  { %v2451_v41 = vmax.f32 %v2406_v22, %v4983_v6  ;;  %v2323_v42 = vmax.f32 %v2233_v24, 0.0  ;;  %v2353_v46 = vmax.f32 %v2263_v25, 0.0 }
 0x1c4   :  { %v2450_v48 = vmax.f32 %v2405_v28, %v4986_v9  ;;  %v2322_v50 = vmax.f32 %v2232_v30, 0.0  ;;  %v2352_v51 = vmax.f32 %v2262_v37, 0.0  ;;  %v3953_v52 = vpop.f32.mrb[10].mxu0  ;;  %v4004_v54 = vpop.f32.mrb[20].mxu1 }
 0x1c5   :  { %v2408_v57 = vmax.f32 %v2318_v15, %v2323_v42  ;;  %v5022_v45 = vmax.f32 %v2348_v39, %v2353_v46  ;;  %v1445_v53 = vpop.f32.mrb[11].mxu0  ;;  %v1790_v59 = vpop.f32.mrb[21].mxu1  ;;  %v2245_v8 = vadd.f32 %v3953_v52, %v4946_v33  ;;  %v2275_v11 = vadd.f32 %v4004_v54, %v4946_v33 }
 0x1c6   :  { %v4173_v60 = vpack.c.bf16 %v2450_v48, %v2449_v10  ;;  %v2407_v61 = vmax.f32 %v2317_v14, %v2322_v50  ;;  %v5024_v0 = vmax.f32 %v2347_v47, %v2352_v51  ;;  %v2244_v10 = vadd.f32 %v4948_v34, %v1445_v53 }
 0x1c7   :  { %v2453_v1 = vmax.f32 %v2408_v57, %v4989_v17  ;;  %v2274_v12 = vadd.f32 %v4948_v34, %v1790_v59  ;;  %v2335_v24 = vmax.f32 %v2245_v8, 0.0  ;;  %v2365_v25 = vmax.f32 %v2275_v11, 0.0 }
 0x1c8   :  { %v2452_v2 = vmax.f32 %v2407_v61, %v4991_v20  ;;  %v3956_v55 = vpop.f32.mrb[12].mxu0  ;;  %v4007_v3 = vpop.f32.mrb[22].mxu1  ;;  %4174 = vmatpush3.bf16.msra.mxu1 %v4173_v60  ;;  %v2334_v28 = vmax.f32 %v2244_v10, 0.0 }
 0x1c9   :  { %v1455_v4 = vpop.f32.mrb[13].mxu0  ;;  %v1800_v5 = vpop.f32.mrb[23].mxu1  ;;  %4175 = vmatprep.subr.bf16.mxu1 %v4387_v31  ;;  %v5034_v13 = vadd.f32 %v3956_v55, %v4956_v40  ;;  %v5037_v14 = vadd.f32 %v4007_v3, %v4956_v40  ;;  %v2364_v30 = vmax.f32 %v2274_v12, 0.0 }
 0x1ca   :  { %v4176_v7 = vpack.c.bf16 %v2452_v2, %v2451_v41  ;;  %v2246_v26 = vadd.f32 %v4954_v38, %v1455_v4  ;;  %v2276_v27 = vadd.f32 %v4954_v38, %v1800_v5 }
 0x1cb   :  { %v2337_v41 = vmax.f32 %v5034_v13, 0.0  ;;  %v2367_v42 = vmax.f32 %v5037_v14, 0.0 }
 0x1cc   :  { %v3959_v15 = vpop.f32.mrb[14].mxu0  ;;  %v4010_v16 = vpop.f32.mrb[24].mxu1  ;;  %4177 = vmatpush3.bf16.msra.mxu1 %v4176_v7  ;;  %v2336_v60 = vmax.f32 %v2246_v26, 0.0  ;;  %v2366_v61 = vmax.f32 %v2276_v27, 0.0 }
 0x1cd   :  { %v2249_v18 = vadd.f32 %v3959_v15, %v4950_v35  ;;  %v2279_v19 = vadd.f32 %v4010_v16, %v4950_v35  ;;  %v1465_v21 = vpop.f32.mrb[15].mxu0  ;;  %v1810_v22 = vpop.f32.mrb[25].mxu1  ;;  %4076 = vmatprep.subr.mxu1 %v4389_v32 }
 0x1ce   :  { %v2248_v46 = vadd.f32 %v4973_v56, %v1465_v21  ;;  %v2278_v47 = vadd.f32 %v4973_v56, %v1810_v22 }
 0x1cf   :  { %v2339_v37 = vmax.f32 %v2249_v18, 0.0  ;;  %v2369_v39 = vmax.f32 %v2279_v19, 0.0 }
 0x1d0   :  { %v3962_v48 = vpop.f32.mrb[16].mxu0  ;;  %v4013_v50 = vpop.f32.mrb[26].mxu1  ;;  %4077 = vmatpush3.msra.mxu1 %v2453_v1  ;;  %v2338_v7 = vmax.f32 %v2248_v46, 0.0  ;;  %v2368_v8 = vmax.f32 %v2278_v47, 0.0 }
 0x1d1   :  { %v2414_v51 = vmax.f32 %v2334_v28, %v2339_v37  ;;  %v5048_v52 = vmax.f32 %v2364_v30, %v2369_v39  ;;  %v2251_v54 = vadd.f32 %v3962_v48, %v4958_v43  ;;  %v2281_v57 = vadd.f32 %v4013_v50, %v4958_v43  ;;  %v1475_v53 = vpop.f32.mrb[17].mxu0  ;;  %v1820_v59 = vpop.f32.mrb[27].mxu1  ;;  %4079 = vmatmul.mubr.msk.f32.vlgmr.msra.gmra.mrb[40].mxu1 %vm2495_vm2, %v4963_v44 }
 0x1d2   :  { %v2250_v2 = vadd.f32 %v4952_v36, %v1475_v53  ;;  %v2280_v55 = vadd.f32 %v4952_v36, %v1820_v59  ;;  %4178 = vmatprep.subr.bf16.mxu1 %v4387_v31  ;;  %4091 = vmatprep.mubr.msk.f32.mxu1 %vm4388_vm1, %v4389_v32 }
 0x1d3   :  { %v2454_v1 = vmax.f32 %v4975_v58, %v2414_v51  ;;  %v2459_v3 = vmax.f32 %v2414_v51, %v5004_v63  ;;  %v2341_v4 = vmax.f32 %v2251_v54, 0.0  ;;  %v2371_v5 = vmax.f32 %v2281_v57, 0.0 }
 0x1d4   :  { %v2340_v11 = vmax.f32 %v2250_v2, 0.0  ;;  %v2370_v10 = vmax.f32 %v2280_v55, 0.0  ;;  %v3965_v12 = vpop.f32.mrb[18].mxu0  ;;  %v4016_v13 = vpop.f32.mrb[28].mxu1 }
 0x1d5   :  { %v2416_v14 = vmax.f32 %v2336_v60, %v2341_v4  ;;  %v5061_v15 = vmax.f32 %v2366_v61, %v2371_v5  ;;  %v2253_v16 = vadd.f32 %v3965_v12, %v4979_v62  ;;  %v2283_v18 = vadd.f32 %v4016_v13, %v4979_v62  ;;  %v1485_v19 = vpop.f32.mrb[19].mxu0  ;;  %v1830_v21 = vpop.f32.mrb[29].mxu1 }
 0x1d6   :  { %v2415_v58 = vmax.f32 %v2335_v24, %v2340_v11  ;;  %v5065_v22 = vmax.f32 %v2365_v25, %v2370_v10  ;;  %v2252_v26 = vadd.f32 %v4968_v49, %v1485_v19  ;;  %v2282_v27 = vadd.f32 %v4968_v49, %v1830_v21 }
 0x1d7   :  { %v2456_v28 = vmax.f32 %v4983_v6, %v2416_v14  ;;  %v2461_v30 = vmax.f32 %v2416_v14, %v5012_v23  ;;  %v2343_v37 = vmax.f32 %v2253_v16, 0.0  ;;  %v2373_v39 = vmax.f32 %v2283_v18, 0.0 }
 0x1d8   :  { %v2455_v46 = vmax.f32 %v4986_v9, %v2415_v58  ;;  %v2460_v47 = vmax.f32 %v2415_v58, %v5016_v29  ;;  %v2342_v48 = vmax.f32 %v2252_v26, 0.0  ;;  %v2372_v50 = vmax.f32 %v2282_v27, 0.0  ;;  %v3987_v51 = vpop.f32.mrb[20].mxu0  ;;  %v4038_v24 = vpop.f32.mrb[30].mxu1 }
 0x1d9   :  { %v5073_v25 = vmax.f32 %v2338_v7, %v2343_v37  ;;  %v5075_v54 = vmax.f32 %v2368_v8, %v2373_v39  ;;  %v1675_v57 = vpop.f32.mrb[21].mxu0  ;;  %v2020_v53 = vpop.f32.mrb[31].mxu1 }
 0x1da   :  { %v4179_v59 = vpack.c.bf16 %v2455_v46, %v2454_v1  ;;  %v4185_v6 = vpack.c.bf16 %v2460_v47, %v2459_v3  ;;  %v2417_v60 = vmax.f32 %v2337_v41, %v2342_v48  ;;  %v5077_v61 = vmax.f32 %v2367_v42, %v2372_v50 }
 0x1db   :  { %v2458_v9 = vmax.f32 %v4989_v17, %v5073_v25  ;;  %v2463_v2 = vmax.f32 %v5073_v25, %v5022_v45  ;;  %v2265_v1 = vadd.f32 %v3987_v51, %v4946_v33  ;;  %v2295_v17 = vadd.f32 %v4038_v24, %v4946_v33 }
 0x1dc   :  { %v2457_v55 = vmax.f32 %v4991_v20, %v2417_v60  ;;  %v2462_v4 = vmax.f32 %v2417_v60, %v5024_v0  ;;  %v3990_v5 = vpop.f32.mrb[22].mxu0  ;;  %v4041_v7 = vpop.f32.mrb[32].mxu1  ;;  %4180 = vmatpush3.bf16.msra.mxu1 %v4179_v59  ;;  %v2264_v3 = vadd.f32 %v4948_v34, %v1675_v57  ;;  %v2294_v20 = vadd.f32 %v4948_v34, %v2020_v53 }
 0x1dd   :  { %v1685_v8 = vpop.f32.mrb[23].mxu0  ;;  %v2030_v11 = vpop.f32.mrb[33].mxu1  ;;  %4181 = vmatprep.subr.bf16.mxu1 %v4387_v31  ;;  %v5093_v10 = vadd.f32 %v3990_v5, %v4956_v40  ;;  %v5096_v12 = vadd.f32 %v4041_v7, %v4956_v40  ;;  %v2355_v58 = vmax.f32 %v2265_v1, 0.0  ;;  %v2385_v26 = vmax.f32 %v2295_v17, 0.0 }
 0x1de   :  { %v4182_v41 = vpack.c.bf16 %v2457_v55, %v2456_v28  ;;  %v5086_v42 = vpack.c.bf16 %v2462_v4, %v2461_v30  ;;  %v2266_v27 = vadd.f32 %v4954_v38, %v1685_v8  ;;  %v2296_v28 = vadd.f32 %v4954_v38, %v2030_v11 }
 0x1df   :  { %v2354_v30 = vmax.f32 %v2264_v3, 0.0  ;;  %v2384_v37 = vmax.f32 %v2294_v20, 0.0  ;;  %v2357_v47 = vmax.f32 %v5093_v10, 0.0  ;;  %v2387_v48 = vmax.f32 %v5096_v12, 0.0 }
 0x1e0   :  { %v3993_v13 = vpop.f32.mrb[24].mxu0  ;;  %v4044_v14 = vpop.f32.mrb[34].mxu1  ;;  %4183 = vmatpush3.bf16.msra.mxu1 %v4182_v41  ;;  %v2356_v7 = vmax.f32 %v2266_v27, 0.0  ;;  %v2386_v8 = vmax.f32 %v2296_v28, 0.0 }
 0x1e1   :  { %v2269_v16 = vadd.f32 %v3993_v13, %v4950_v35  ;;  %v2299_v18 = vadd.f32 %v4044_v14, %v4950_v35  ;;  %v1695_v19 = vpop.f32.mrb[25].mxu0  ;;  %v2040_v21 = vpop.f32.mrb[35].mxu1  ;;  %4089 = vmatprep.subr.mxu1 %v4389_v32 }
 0x1e2   :  { %v2268_v50 = vadd.f32 %v4973_v56, %v1695_v19  ;;  %v2298_v51 = vadd.f32 %v4973_v56, %v2040_v21 }
 0x1e3   :  { %v2359_v39 = vmax.f32 %v2269_v16, 0.0  ;;  %v2389_v46 = vmax.f32 %v2299_v18, 0.0 }
 0x1e4   :  { %v3996_v24 = vpop.f32.mrb[26].mxu0  ;;  %v4047_v57 = vpop.f32.mrb[36].mxu1  ;;  %4090 = vmatpush3.msra.mxu1 %v2458_v9  ;;  %v2358_v20 = vmax.f32 %v2268_v50, 0.0  ;;  %v2388_v10 = vmax.f32 %v2298_v51, 0.0 }
 0x1e5   :  { %v2424_v53 = vmax.f32 %v2354_v30, %v2359_v39  ;;  %v5107_v59 = vmax.f32 %v2384_v37, %v2389_v46  ;;  %v2271_v60 = vadd.f32 %v3996_v24, %v4958_v43  ;;  %v2301_v55 = vadd.f32 %v4047_v57, %v4958_v43  ;;  %v1705_v4 = vpop.f32.mrb[27].mxu0  ;;  %v2050_v5 = vpop.f32.mrb[37].mxu1  ;;  %4092 = vmatmul.mubr.msk.f32.vlgmr.msra.gmra.mrb[42].mxu1 %vm2495_vm2, %v4963_v44 }
 0x1e6   :  { %v2270_v11 = vadd.f32 %v4952_v36, %v1705_v4  ;;  %v2300_v41 = vadd.f32 %v4952_v36, %v2050_v5  ;;  %4184 = vmatprep.subr.bf16.mxu1 %v4387_v31  ;;  %4104 = vmatprep.mubr.msk.f32.mxu1 %vm4388_vm1, %v4389_v32 }
 0x1e7   :  { %v2464_v9 = vmax.f32 %v5004_v63, %v2424_v53  ;;  %v2469_v1 = vmax.f32 %v2424_v53, %v5048_v52  ;;  %v2361_v17 = vmax.f32 %v2271_v60, 0.0  ;;  %v2391_v3 = vmax.f32 %v2301_v55, 0.0  ;;  %4186 = vmatpush3.bf16.msra.mxu1 %v4185_v6 }
 0x1e8   :  { %v2360_v12 = vmax.f32 %v2270_v11, 0.0  ;;  %v2390_v13 = vmax.f32 %v2300_v41, 0.0  ;;  %v3999_v14 = vpop.f32.mrb[28].mxu0  ;;  %v4050_v16 = vpop.f32.mrb[38].mxu1  ;;  %4187 = vmatprep.subr.bf16.mxu1 %v4387_v31 }
 0x1e9   :  { %v2426_v18 = vmax.f32 %v2356_v7, %v2361_v17  ;;  %v5121_v19 = vmax.f32 %v2386_v8, %v2391_v3  ;;  %v2273_v21 = vadd.f32 %v3999_v14, %v4979_v62  ;;  %v2303_v63 = vadd.f32 %v4050_v16, %v4979_v62  ;;  %v1715_v27 = vpop.f32.mrb[29].mxu0  ;;  %v2060_v28 = vpop.f32.mrb[39].mxu1 }
 0x1ea   :  { %v2425_v30 = vmax.f32 %v2355_v58, %v2360_v12  ;;  %v5125_v37 = vmax.f32 %v2385_v26, %v2390_v13  ;;  %v2272_v6 = vadd.f32 %v4968_v49, %v1715_v27  ;;  %v2302_v39 = vadd.f32 %v4968_v49, %v2060_v28 }
 0x1eb   :  { %v2466_v46 = vmax.f32 %v5012_v23, %v2426_v18  ;;  %v2471_v50 = vmax.f32 %v2426_v18, %v5061_v15  ;;  %v2363_v51 = vmax.f32 %v2273_v21, 0.0  ;;  %v2393_v24 = vmax.f32 %v2303_v63, 0.0  ;;  %4189 = vmatpush3.bf16.msra.mxu1 %v5086_v42 }
 0x1ec   :  { %v2465_v57 = vmax.f32 %v5016_v29, %v2425_v30  ;;  %v2470_v53 = vmax.f32 %v2425_v30, %v5065_v22  ;;  %v2362_v60 = vmax.f32 %v2272_v6, 0.0  ;;  %v2392_v58 = vmax.f32 %v2302_v39, 0.0  ;;  %v4021_v26 = vpop.f32.mrb[30].mxu0  ;;  %4102 = vmatprep.subr.mxu1 %v4389_v32 }
 0x1ed   :  { %v2428_v55 = vmax.f32 %v2358_v20, %v2363_v51  ;;  %v5135_v4 = vmax.f32 %v2388_v10, %v2393_v24  ;;  %v1905_v5 = vpop.f32.mrb[31].mxu0  ;;  %v2285_v12 = vadd.f32 %v4021_v26, %v4946_v33 }
 0x1ee   :  { %v4191_v23 = vpack.c.bf16 %v2465_v57, %v2464_v9  ;;  %v4197_v7 = vpack.c.bf16 %v2470_v53, %v2469_v1  ;;  %v2427_v8 = vmax.f32 %v2357_v47, %v2362_v60  ;;  %v5137_v11 = vmax.f32 %v2387_v48, %v2392_v58 }
 0x1ef   :  { %v2468_v42 = vmax.f32 %v5022_v45, %v2428_v55  ;;  %v2473_v29 = vmax.f32 %v2428_v55, %v5075_v54  ;;  %4103 = vmatpush3.msra.mxu1 %v2463_v2  ;;  %v2284_v45 = vadd.f32 %v4948_v34, %v1905_v5  ;;  %v2375_v39 = vmax.f32 %v2285_v12, 0.0 }
 0x1f0   :  { %v2467_v41 = vmax.f32 %v5024_v0, %v2427_v8  ;;  %v2472_v17 = vmax.f32 %v2427_v8, %v5077_v61  ;;  %4105 = vmatmul.mubr.msk.f32.vlgmr.msra.gmra.mrb[44].mxu1 %vm2495_vm2, %v4963_v44  ;;  %4190 = vmatprep.subr.bf16.mxu1 %v4387_v31  ;;  %v4024_v47 = vpop.f32.mrb[32].mxu0 }
 0x1f1   :  { %4192 = vmatpush3.bf16.msra.mxu1 %v4191_v23  ;;  %4198 = vmatpush3.bf16.msra.mxu0 %v4197_v7  ;;  %v1915_v48 = vpop.f32.mrb[33].mxu0  ;;  %v2374_v20 = vmax.f32 %v2284_v45, 0.0 }
 0x1f2   :  { %v4194_v9 = vpack.c.bf16 %v2467_v41, %v2466_v46  ;;  %v4200_v1 = vpack.c.bf16 %v2472_v17, %v2471_v50  ;;  %4193 = vmatprep.subr.bf16.mxu1 %v4387_v31  ;;  %4199 = vmatprep.subr.bf16.mxu0 %v4387_v31  ;;  %v2286_v3 = vadd.f32 %v4954_v38, %v1915_v48 }
 0x1f3   :  { %4117 = vmatprep.mubr.msk.f32.mxu1 %vm4388_vm1, %v4389_v32  ;;  %v2287_v46 = vadd.f32 %v4024_v47, %v4956_v40 }
 0x1f4   :  { %v4027_v0 = vpop.f32.mrb[34].mxu0  ;;  %v2376_v21 = vmax.f32 %v2286_v3, 0.0 }
 0x1f5   :  { %v2289_v25 = vadd.f32 %v4027_v0, %v4950_v35  ;;  %4195 = vmatpush3.bf16.msra.mxu1 %v4194_v9  ;;  %4201 = vmatpush3.bf16.msra.mxu0 %v4200_v1  ;;  %v1925_v2 = vpop.f32.mrb[35].mxu0  ;;  %v2377_v23 = vmax.f32 %v2287_v46, 0.0 }
 0x1f6   :  { %4115 = vmatprep.subr.mxu1 %v4389_v32  ;;  %4128 = vmatprep.subr.mxu0 %v4389_v32  ;;  %v2288_v30 = vadd.f32 %v4973_v56, %v1925_v2 }
 0x1f7   :  { %v2379_v10 = vmax.f32 %v2289_v25, 0.0 }
 0x1f8   :  { %v4030_v13 = vpop.f32.mrb[36].mxu0  ;;  %v2378_v58 = vmax.f32 %v2288_v30, 0.0 }
 0x1f9   :  { %v2434_v14 = vmax.f32 %v2374_v20, %v2379_v10  ;;  %v2291_v16 = vadd.f32 %v4030_v13, %v4958_v43  ;;  %4116 = vmatpush3.msra.mxu1 %v2468_v42  ;;  %4129 = vmatpush3.msra.mxu0 %v2473_v29  ;;  %v1935_v18 = vpop.f32.mrb[37].mxu0 }
 0x1fa   :  { %v2290_v63 = vadd.f32 %v4952_v36, %v1935_v18  ;;  %4118 = vmatmul.mubr.msk.f32.vlgmr.msra.gmra.mrb[46].mxu1 %vm2495_vm2, %v4963_v44  ;;  %4131 = vmatmul.mubr.msk.f32.vlgmr.msra.gmra.mrb[50].mxu0 %vm2495_vm2, %v4963_v44 }
 0x1fb   :  { %v2474_v27 = vmax.f32 %v5048_v52, %v2434_v14  ;;  %v2479_v28 = vmax.f32 %v2434_v14, %v5107_v59  ;;  %v2381_v6 = vmax.f32 %v2291_v16, 0.0  ;;  %4202 = vmatprep.subr.bf16.mxu1 %v4387_v31  ;;  %4208 = vmatprep.subr.bf16.mxu0 %v4387_v31 }
 0x1fc   :  { %v2380_v50 = vmax.f32 %v2290_v63, 0.0  ;;  %v4033_v51 = vpop.f32.mrb[38].mxu0  ;;  %4143 = vmatprep.mubr.msk.f32.mxu1 %vm4388_vm1, %v4389_v32  ;;  %4156 = vmatprep.mubr.msk.f32.mxu0 %vm4388_vm1, %v4389_v32 }
 0x1fd   :  { %v2436_v52 = vmax.f32 %v2376_v21, %v2381_v6  ;;  %v2293_v24 = vadd.f32 %v4033_v51, %v4979_v62  ;;  %v1945_v57 = vpop.f32.mrb[39].mxu0 }
 0x1fe   :  { %v2435_v53 = vmax.f32 %v2375_v39, %v2380_v50  ;;  %v2292_v60 = vadd.f32 %v4968_v49, %v1945_v57 }
 0x1ff   :  { %v2476_v26 = vmax.f32 %v5061_v15, %v2436_v52  ;;  %v2481_v55 = vmax.f32 %v2436_v52, %v5121_v19  ;;  %v2383_v5 = vmax.f32 %v2293_v24, 0.0 }
 0x200   :  { %v2475_v7 = vmax.f32 %v5065_v22, %v2435_v53  ;;  %v2480_v8 = vmax.f32 %v2435_v53, %v5125_v37  ;;  %v2382_v42 = vmax.f32 %v2292_v60, 0.0  ;;  %v4055_v29 = vpop.f32.mrb[40].mxu0 }
 0x201   :  { %v2438_v41 = vmax.f32 %v2378_v58, %v2383_v5  ;;  %v2135_v17 = vpop.f32.mrb[41].mxu0  ;;  %v2305_v16 = vadd.f32 %v4055_v29, %v4946_v33 }
 0x202   :  { %v4203_v47 = vpack.c.bf16 %v2475_v7, %v2474_v27  ;;  %v4209_v48 = vpack.c.bf16 %v2480_v8, %v2479_v28  ;;  %v2437_v9 = vmax.f32 %v2377_v23, %v2382_v42  ;;  %v2304_v20 = vadd.f32 %v4948_v34, %v2135_v17 }
 0x203   :  { %v2478_v1 = vmax.f32 %v5075_v54, %v2438_v41  ;;  %v2483_v45 = vmax.f32 %v2438_v41, %v5135_v4  ;;  %v2395_v28 = vmax.f32 %v2305_v16, 0.0 }
 0x204   :  { %v2477_v15 = vmax.f32 %v5077_v61, %v2437_v9  ;;  %v2482_v0 = vmax.f32 %v2437_v9, %v5137_v11  ;;  %v4058_v25 = vpop.f32.mrb[42].mxu0  ;;  %4204 = vmatpush3.bf16.msra.mxu1 %v4203_v47  ;;  %4210 = vmatpush3.bf16.msra.mxu0 %v4209_v48  ;;  %v2394_v12 = vmax.f32 %v2304_v20, 0.0 }
 0x205   :  { %v2145_v22 = vpop.f32.mrb[43].mxu0  ;;  %4205 = vmatprep.subr.bf16.mxu1 %v4387_v31  ;;  %4211 = vmatprep.subr.bf16.mxu0 %v4387_v31  ;;  %v2307_v30 = vadd.f32 %v4058_v25, %v4956_v40 }
 0x206   :  { %v4206_v2 = vpack.c.bf16 %v2477_v15, %v2476_v26  ;;  %v4212_v3 = vpack.c.bf16 %v2482_v0, %v2481_v55  ;;  %v2306_v13 = vadd.f32 %v4954_v38, %v2145_v22 }
 0x208   :  { %v4061_v10 = vpop.f32.mrb[44].mxu0  ;;  %4207 = vmatpush3.bf16.msra.mxu1 %v4206_v2  ;;  %4213 = vmatpush3.bf16.msra.mxu0 %v4212_v3  ;;  %v2396_v33 = vmax.f32 %v2306_v13, 0.0 }
 0x209   :  { %v2309_v54 = vadd.f32 %v4061_v10, %v4950_v35  ;;  %v2155_v61 = vpop.f32.mrb[45].mxu0  ;;  %4141 = vmatprep.subr.mxu1 %v4389_v32  ;;  %4154 = vmatprep.subr.mxu0 %v4389_v32 }
 0x20a   :  { %v2308_v27 = vadd.f32 %v4973_v56, %v2155_v61 }
 0x20b   :  { %v2399_v14 = vmax.f32 %v2309_v54, 0.0 }
 0x20c   :  { %v4064_v18 = vpop.f32.mrb[46].mxu0  ;;  %4142 = vmatpush3.msra.mxu1 %v2478_v1  ;;  %4155 = vmatpush3.msra.mxu0 %v2483_v45  ;;  %v2398_v24 = vmax.f32 %v2308_v27, 0.0 }
 0x20d   :  { %v2444_v34 = vmax.f32 %v2394_v12, %v2399_v14  ;;  %v2311_v21 = vadd.f32 %v4064_v18, %v4958_v43  ;;  %v2165_v63 = vpop.f32.mrb[47].mxu0  ;;  %4144 = vmatmul.mubr.msk.f32.vlgmr.msra.gmra.mrb[48].mxu1 %vm2495_vm2, %v4963_v44  ;;  %4157 = vmatmul.mubr.msk.f32.vlgmr.msra.gmra.mrb[52].mxu0 %vm2495_vm2, %v4963_v44  ;;  %v3099_v12 = vlaneseq }
 0x20e   :  { %v2310_v35 = vadd.f32 %v4952_v36, %v2165_v63  ;;  %4214 = vmatprep.subr.bf16.mxu1 %v4387_v31  ;;  %4169 = vmatprep.mubr.msk.f32.mxu1 %vm4388_vm1, %v4389_v32 }
 0x20f   :  { %v2484_v38 = vmax.f32 %v5107_v59, %v2444_v34  ;;  %v2401_v43 = vmax.f32 %v2311_v21, 0.0  ;;  %v2397_v59 = vmax.f32 %v2307_v30, 0.0  ;;  %v3100_v13 = vshrl.u32 %v3099_v12, 7 }
 0x210   :  { %v2400_v6 = vmax.f32 %v2310_v35, 0.0  ;;  %v4067_v39 = vpop.f32.mrb[48].mxu0 }
 0x211   :  { %v2446_v46 = vmax.f32 %v2396_v33, %v2401_v43  ;;  %v2313_v50 = vadd.f32 %v4067_v39, %v4979_v62  ;;  %v2175_v36 = vpop.f32.mrb[49].mxu0  ;;  %v5230_v16 = vsub.s32 2, %v3100_v13 }
 0x212   :  { %v2445_v51 = vmax.f32 %v2395_v28, %v2400_v6  ;;  %v2312_v52 = vadd.f32 %v4968_v49, %v2175_v36  ;;  %v5215_v49 = vpop.permute.xlu1 %2492 }
 0x213   :  { %v2486_v57 = vmax.f32 %v5121_v19, %v2446_v46  ;;  %v2403_v53 = vmax.f32 %v2313_v50, 0.0 }
 0x214   :  { %v2485_v56 = vmax.f32 %v5125_v37, %v2445_v51  ;;  %v2402_v60 = vmax.f32 %v2312_v52, 0.0 }
 0x215   :  { %v2448_v58 = vmax.f32 %v2398_v24, %v2403_v53 }
 0x216   :  { %v4215_v26 = vpack.c.bf16 %v2485_v56, %v2484_v38  ;;  %v2447_v40 = vmax.f32 %v2397_v59, %v2402_v60 }
 0x217   :  { %v2488_v55 = vmax.f32 %v5135_v4, %v2448_v58 }
 0x218   :  { %v2487_v5 = vmax.f32 %v5137_v11, %v2447_v40  ;;  %4216 = vmatpush3.bf16.msra.mxu1 %v4215_v26  ;;  %v5219_v11 = vpop.permute.xlu0 %3068 }
 0x219   :  { %4217 = vmatprep.subr.bf16.mxu1 %v4387_v31  ;;  %v3072_v31 = vmul.f32 0.0, %v5219_v11 }
 0x21a   :  { %v4218_v62 = vpack.c.bf16 %v2487_v5, %v2486_v57 }
 0x21c   :  { %4219 = vmatpush3.bf16.msra.mxu1 %v4218_v62 }
 0x21d   :  { %4167 = vmatprep.subr.mxu1 %v4389_v32 }
 0x220   :  { %4168 = vmatpush3.msra.mxu1 %v2488_v55 }
 0x221   :  { %4170 = vmatmul.mubr.msk.f32.vlgmr.msra.gmra.mrb[50].mxu1 %vm2495_vm2, %v4963_v44 }
 0x2a4   :  { %v2564_v19 = vpop.f32.mrb[40].mxu1 }
 0x2a5   :  { %v2565_v37 = vadd.f32 %v2564_v19, %v5215_v49  ;;  %v4080_v4 = vpop.f32.mrb[41].mxu1 }
 0x2a7   :  { %3059 = vst.msk [vmem:[#allocation2] sm:$0xf] %vm3058_vm3, %v2565_v37 }
 0x2ae   :  { %v3071_v23 = vld [vmem:[#allocation2] sm:$0xf] }
 0x2af   :  { %v3073_v7 = vadd.f32 %v3072_v31, %v3071_v23 }
 0x2b1   :  { %v3508_v32 = vmul.f32 -1.442695, %v3073_v7 }
 0x2b3   :  { %4321 = vpow2.f32 %v3508_v32 }
 0x2b4   :  { %4323 = vtanh.f32 %v3073_v7 }
 0x2b8   :  { %v2634_v8 = vpop.f32.mrb[42].mxu1 }
 0x2b9   :  { %v2635_v44 = vadd.f32 %v2634_v8, %v5215_v49  ;;  %v4093_v42 = vpop.f32.mrb[43].mxu1 }
 0x2bb   :  { %3060 = vst.msk [vmem:[#allocation2 + $0x4] sm:$0xf] %vm3058_vm3, %v2635_v44 }
 0x2bd   :  { %v4322_v29 = vpop.eup %4321 }
 0x2be   :  { %v3077_v41 = vadd.f32 1.0, %v4322_v29  ;;  %v4324_v9 = vpop.eup %4323 }
 0x2bf   :  { %v3083_v1 = vrot.slane %v4324_v9, 3 }
 0x2c0   :  { %4325 = vrcp.f32 %v3077_v41 }
 0x2c2   :  { %v3098_v30 = vld [vmem:[#allocation2 + $0x4] sm:$0xf] }
 0x2c3   :  { %v2704_v17 = vpop.f32.mrb[44].mxu1 }
 0x2c4   :  { %v2705_v47 = vadd.f32 %v2704_v17, %v5215_v49  ;;  %v4106_v48 = vpop.f32.mrb[45].mxu1 }
 0x2c6   :  { %3061 = vst.msk [vmem:[#allocation2 + $0x8] sm:$0xf] %vm3058_vm3, %v2705_v47 }
 0x2ca   :  { %v4326_v45 = vpop.eup %4325 }
 0x2cb   :  { %v3085_v15 = vmul.f32 %v4326_v45, %v3083_v1  ;;  %v3081_v0 = vmul.f32 0.0, %v4326_v45 }
 0x2cd   :  { %v3087_v25 = vrot.slane %v3085_v15, 7  ;;  %v2774_v22 = vpop.f32.mrb[46].mxu1  ;;  %v2844_v2 = vpop.f32.mrb[50].mxu0 }
 0x2ce   :  { %v2775_v3 = vadd.f32 %v2774_v22, %v5215_v49  ;;  %v2845_v20 = vadd.f32 %v2844_v2, %v5215_v49  ;;  %v4119_v10 = vpop.f32.mrb[47].mxu1  ;;  %v4132_v54 = vpop.f32.mrb[51].mxu0 }
 0x2cf   :  { %v3089_v61 = vadd.f32 %v3087_v25, %v3081_v0 }
 0x2d0   :  { %3062 = vst.msk [vmem:[#allocation2 + $0xc] sm:$0xf] %vm3058_vm3, %v2775_v3  ;;  %3063 = vst.msk [vmem:[#allocation2 + $0x10] sm:$0xf] %vm3058_vm3, %v2845_v20 }
 0x2d1   :  { %4327 = vtanh.f32 %v3089_v61 }
 0x2d7   :  { %v3158_v1 = vld [vmem:[#allocation2 + $0xc] sm:$0xf] }
 0x2db   :  { %v4328_v14 = vpop.eup %4327 }
 0x2dc   :  { %v3092_v18 = vrot.slane %v4328_v14, 7 }
 0x2de   :  { %v3094_v34 = vmul.f32 %v4326_v45, %v3092_v18 }
 0x2e0   :  { %3096 = vst.msk [vmem:[%s5287_s3 - $0x2] sm:$0x4] %vm3095_vm4, %v3094_v34  ;;  %v3102_v21 = vrot.slane %v3094_v34, %v5230_v16  ;;  %v2914_v63 = vpop.f32.mrb[48].mxu1  ;;  %v2984_v35 = vpop.f32.mrb[52].mxu0 }
 0x2e1   :  { %v2915_v33 = vadd.f32 %v2914_v63, %v5215_v49  ;;  %v2985_v38 = vadd.f32 %v2984_v35, %v5215_v49  ;;  %v4145_v27 = vpop.f32.mrb[49].mxu1  ;;  %v4158_v43 = vpop.f32.mrb[53].mxu0 }
 0x2e2   :  { %v3103_v28 = vmul.f32 %v3102_v21, %v5219_v11  ;;  %v3188_v21 = vld [vmem:[#allocation2 + $0x10] sm:$0xf] }
 0x2e3   :  { %3064 = vst.msk [vmem:[#allocation2 + $0x14] sm:$0xf] %vm3058_vm3, %v2915_v33  ;;  %3065 = vst.msk [vmem:[#allocation2 + $0x18] sm:$0xf] %vm3058_vm3, %v2985_v38 }
 0x2e4   :  { %v3104_v6 = vadd.f32 %v3103_v28, %v3098_v30 }
 0x2e6   :  { %v3509_v39 = vmul.f32 -1.442695, %v3104_v6 }
 0x2e8   :  { %4329 = vpow2.f32 %v3509_v39 }
 0x2e9   :  { %4331 = vtanh.f32 %v3104_v6 }
 0x2f2   :  { %v4330_v46 = vpop.eup %4329 }
 0x2f3   :  { %v3108_v50 = vadd.f32 1.0, %v4330_v46  ;;  %v4332_v24 = vpop.eup %4331 }
 0x2f4   :  { %v3054_v36 = vpop.f32.mrb[50].mxu1  ;;  %v3114_v57 = vrot.slane %v4332_v24, 3 }
 0x2f5   :  { %4333 = vrcp.f32 %v3108_v50  ;;  %v3055_v51 = vadd.f32 %v3054_v36, %v5215_v49  ;;  %v4171_v52 = vpop.f32.mrb[51].mxu1  ;;  %v3128_v49 = vld [vmem:[#allocation2 + $0x8] sm:$0xf] }
 0x2f7   :  { %3066 = vst.msk [vmem:[#allocation2 + $0x1c] sm:$0xf] %vm3058_vm3, %v3055_v51 }
 0x2ff   :  { %v4334_v53 = vpop.eup %4333 }
 0x300   :  { %v3116_v59 = vmul.f32 %v4334_v53, %v3114_v57  ;;  %v3112_v56 = vmul.f32 %v4334_v53, %v3089_v61  ;;  %v3218_v57 = vld [vmem:[#allocation2 + $0x14] sm:$0xf] }
 0x302   :  { %v3118_v60 = vrot.slane %v3116_v59, 7 }
 0x304   :  { %v3120_v58 = vadd.f32 %v3118_v60, %v3112_v56 }
 0x306   :  { %4335 = vtanh.f32 %v3120_v58 }
 0x310   :  { %v4336_v26 = vpop.eup %4335 }
 0x311   :  { %v3123_v40 = vrot.slane %v4336_v26, 7 }
 0x313   :  { %v3125_v55 = vmul.f32 %v4334_v53, %v3123_v40 }
 0x315   :  { %3126 = vst.msk [vmem:[%s5287_s3 - $0x1] sm:$0x4] %vm3095_vm4, %v3125_v55  ;;  %v3132_v5 = vrot.slane %v3125_v55, %v5230_v16 }
 0x317   :  { %v3133_v62 = vmul.f32 %v3132_v5, %v5219_v11 }
 0x319   :  { %v3134_v19 = vadd.f32 %v3133_v62, %v3128_v49 }
 0x31b   :  { %v3510_v37 = vmul.f32 -1.442695, %v3134_v19 }
 0x31d   :  { %4337 = vpow2.f32 %v3510_v37 }
 0x31e   :  { %4339 = vtanh.f32 %v3134_v19 }
 0x327   :  { %v4338_v4 = vpop.eup %4337 }
 0x328   :  { %v3138_v31 = vadd.f32 1.0, %v4338_v4  ;;  %v4340_v23 = vpop.eup %4339 }
 0x329   :  { %v3144_v7 = vrot.slane %v4340_v23, 3 }
 0x32a   :  { %4341 = vrcp.f32 %v3138_v31 }
 0x334   :  { %v4342_v32 = vpop.eup %4341 }
 0x335   :  { %v3146_v8 = vmul.f32 %v4342_v32, %v3144_v7  ;;  %v3142_v44 = vmul.f32 %v4342_v32, %v3120_v58  ;;  %v3248_v7 = vld [vmem:[#allocation2 + $0x18] sm:$0xf] }
 0x337   :  { %v3148_v42 = vrot.slane %v3146_v8, 7 }
 0x339   :  { %v3150_v29 = vadd.f32 %v3148_v42, %v3142_v44 }
 0x33b   :  { %4343 = vtanh.f32 %v3150_v29 }
 0x345   :  { %v4344_v41 = vpop.eup %4343 }
 0x346   :  { %v3153_v17 = vrot.slane %v4344_v41, 7 }
 0x348   :  { %v3155_v47 = vmul.f32 %v4342_v32, %v3153_v17 }
 0x34a   :  { %3156 = vst.msk [vmem:[%s5287_s3] sm:$0x4] %vm3095_vm4, %v3155_v47  ;;  %v3162_v48 = vrot.slane %v3155_v47, %v5230_v16 }
 0x34c   :  { %v3163_v9 = vmul.f32 %v3162_v48, %v5219_v11 }
 0x34e   :  { %v3164_v45 = vadd.f32 %v3163_v9, %v3158_v1 }
 0x350   :  { %v3511_v15 = vmul.f32 -1.442695, %v3164_v45 }
 0x352   :  { %4345 = vpow2.f32 %v3511_v15 }
 0x353   :  { %4347 = vtanh.f32 %v3164_v45 }
 0x35c   :  { %v4346_v0 = vpop.eup %4345 }
 0x35d   :  { %v3168_v25 = vadd.f32 1.0, %v4346_v0  ;;  %v4348_v22 = vpop.eup %4347 }
 0x35e   :  { %v3174_v2 = vrot.slane %v4348_v22, 3 }
 0x35f   :  { %4349 = vrcp.f32 %v3168_v25 }
 0x369   :  { %v4350_v3 = vpop.eup %4349 }
 0x36a   :  { %v3176_v20 = vmul.f32 %v4350_v3, %v3174_v2  ;;  %v3172_v10 = vmul.f32 %v4350_v3, %v3150_v29  ;;  %v3278_v2 = vld [vmem:[#allocation2 + $0x1c] sm:$0xf] }
 0x36c   :  { %v3178_v54 = vrot.slane %v3176_v20, 7 }
 0x36e   :  { %v3180_v61 = vadd.f32 %v3178_v54, %v3172_v10 }
 0x370   :  { %4351 = vtanh.f32 %v3180_v61 }
 0x37a   :  { %v4352_v12 = vpop.eup %4351 }
 0x37b   :  { %v3183_v13 = vrot.slane %v4352_v12, 7 }
 0x37d   :  { %v3185_v14 = vmul.f32 %v4350_v3, %v3183_v13 }
 0x37f   :  { %3186 = vst.msk [vmem:[%s5287_s3 + $0x1] sm:$0x4] %vm3095_vm4, %v3185_v14  ;;  %v3192_v18 = vrot.slane %v3185_v14, %v5230_v16 }
 0x381   :  { %v3193_v34 = vmul.f32 %v3192_v18, %v5219_v11 }
 0x383   :  { %v3194_v63 = vadd.f32 %v3193_v34, %v3188_v21 }
 0x385   :  { %v3512_v35 = vmul.f32 -1.442695, %v3194_v63 }
 0x387   :  { %4353 = vpow2.f32 %v3512_v35 }
 0x388   :  { %4355 = vtanh.f32 %v3194_v63 }
 0x391   :  { %v4354_v33 = vpop.eup %4353 }
 0x392   :  { %v3198_v38 = vadd.f32 1.0, %v4354_v33  ;;  %v4356_v27 = vpop.eup %4355 }
 0x393   :  { %v3204_v43 = vrot.slane %v4356_v27, 3 }
 0x394   :  { %4357 = vrcp.f32 %v3198_v38 }
 0x39e   :  { %v4358_v28 = vpop.eup %4357 }
 0x39f   :  { %v3206_v30 = vmul.f32 %v4358_v28, %v3204_v43  ;;  %v3202_v6 = vmul.f32 %v4358_v28, %v3180_v61 }
 0x3a1   :  { %v3208_v39 = vrot.slane %v3206_v30, 7 }
 0x3a3   :  { %v3210_v46 = vadd.f32 %v3208_v39, %v3202_v6 }
 0x3a5   :  { %4359 = vtanh.f32 %v3210_v46 }
 0x3af   :  { %v4360_v50 = vpop.eup %4359 }
 0x3b0   :  { %v3213_v36 = vrot.slane %v4360_v50, 7 }
 0x3b2   :  { %v3215_v51 = vmul.f32 %v4358_v28, %v3213_v36 }
 0x3b4   :  { %3216 = vst.msk [vmem:[%s5287_s3 + $0x2] sm:$0x4] %vm3095_vm4, %v3215_v51  ;;  %v3222_v52 = vrot.slane %v3215_v51, %v5230_v16 }
 0x3b6   :  { %v3223_v24 = vmul.f32 %v3222_v52, %v5219_v11 }
 0x3b8   :  { %v3224_v53 = vadd.f32 %v3223_v24, %v3218_v57 }
 0x3ba   :  { %v3513_v59 = vmul.f32 -1.442695, %v3224_v53 }
 0x3bc   :  { %4361 = vpow2.f32 %v3513_v59 }
 0x3bd   :  { %4363 = vtanh.f32 %v3224_v53 }
 0x3c6   :  { %v4362_v56 = vpop.eup %4361 }
 0x3c7   :  { %v3228_v60 = vadd.f32 1.0, %v4362_v56  ;;  %v4364_v58 = vpop.eup %4363 }
 0x3c8   :  { %v3234_v26 = vrot.slane %v4364_v58, 3 }
 0x3c9   :  { %4365 = vrcp.f32 %v3228_v60 }
 0x3d3   :  { %v4366_v40 = vpop.eup %4365 }
 0x3d4   :  { %v3236_v55 = vmul.f32 %v4366_v40, %v3234_v26  ;;  %v3232_v5 = vmul.f32 %v4366_v40, %v3210_v46 }
 0x3d6   :  { %v3238_v62 = vrot.slane %v3236_v55, 7 }
 0x3d8   :  { %v3240_v49 = vadd.f32 %v3238_v62, %v3232_v5 }
 0x3da   :  { %4367 = vtanh.f32 %v3240_v49 }
 0x3e4   :  { %v4368_v19 = vpop.eup %4367 }
 0x3e5   :  { %v3243_v37 = vrot.slane %v4368_v19, 7 }
 0x3e7   :  { %v3245_v4 = vmul.f32 %v4366_v40, %v3243_v37 }
 0x3e9   :  { %3246 = vst.msk [vmem:[%s5287_s3 + $0x3] sm:$0x4] %vm3095_vm4, %v3245_v4  ;;  %v3252_v31 = vrot.slane %v3245_v4, %v5230_v16 }
 0x3eb   :  { %v3253_v23 = vmul.f32 %v3252_v31, %v5219_v11 }
 0x3ed   :  { %v3254_v32 = vadd.f32 %v3253_v23, %v3248_v7 }
 0x3ef   :  { %v3514_v8 = vmul.f32 -1.442695, %v3254_v32 }
 0x3f1   :  { %4369 = vpow2.f32 %v3514_v8 }
 0x3f2   :  { %4371 = vtanh.f32 %v3254_v32 }
 0x3fb   :  { %v4370_v44 = vpop.eup %4369 }
 0x3fc   :  { %v3258_v42 = vadd.f32 1.0, %v4370_v44  ;;  %v4372_v29 = vpop.eup %4371 }
 0x3fd   :  { %v3264_v41 = vrot.slane %v4372_v29, 3 }
 0x3fe   :  { %4373 = vrcp.f32 %v3258_v42 }
 0x408   :  { %v4374_v17 = vpop.eup %4373 }
 0x409   :  { %v3266_v47 = vmul.f32 %v4374_v17, %v3264_v41  ;;  %v3262_v48 = vmul.f32 %v4374_v17, %v3240_v49 }
 0x40b   :  { %v3268_v9 = vrot.slane %v3266_v47, 7 }
 0x40d   :  { %v3270_v1 = vadd.f32 %v3268_v9, %v3262_v48 }
 0x40f   :  { %4375 = vtanh.f32 %v3270_v1 }
 0x419   :  { %v4376_v45 = vpop.eup %4375 }
 0x41a   :  { %v3273_v15 = vrot.slane %v4376_v45, 7 }
 0x41c   :  { %v3275_v0 = vmul.f32 %v4374_v17, %v3273_v15 }
 0x41e   :  { %3276 = vst.msk [vmem:[%s5287_s3 + $0x4] sm:$0x4] %vm3095_vm4, %v3275_v0  ;;  %v3282_v25 = vrot.slane %v3275_v0, %v5230_v16 }
 0x420   :  { %v3283_v22 = vmul.f32 %v3282_v25, %v5219_v11 }
 0x422   :  { %v3284_v3 = vadd.f32 %v3283_v22, %v3278_v2 }
 0x424   :  { %v3515_v20 = vmul.f32 -1.442695, %v3284_v3 }
 0x426   :  { %4377 = vpow2.f32 %v3515_v20 }
 0x427   :  { %4379 = vtanh.f32 %v3284_v3 }
 0x430   :  { %v4378_v10 = vpop.eup %4377 }
 0x431   :  { %v3288_v54 = vadd.f32 1.0, %v4378_v10  ;;  %v4380_v61 = vpop.eup %4379 }
 0x432   :  { %v3294_v12 = vrot.slane %v4380_v61, 3 }
 0x433   :  { %4381 = vrcp.f32 %v3288_v54 }
 0x43d   :  { %v4382_v13 = vpop.eup %4381 }
 0x43e   :  { %v3296_v14 = vmul.f32 %v4382_v13, %v3294_v12  ;;  %v3292_v18 = vmul.f32 %v4382_v13, %v3270_v1 }
 0x440   :  { %v3298_v34 = vrot.slane %v3296_v14, 7 }
 0x442   :  { %v3300_v21 = vadd.f32 %v3298_v34, %v3292_v18 }
 0x444   :  { %4383 = vtanh.f32 %v3300_v21 }
 0x44e   :  { %v4384_v63 = vpop.eup %4383 }
 0x44f   :  { %v3303_v16 = vrot.slane %v4384_v63, 7 }
 0x451   :  { %v3305_v35 = vmul.f32 %v4382_v13, %v3303_v16 }
 0x453   :  { %3306 = vst.msk [vmem:[%s5287_s3 + $0x5] sm:$0x4] %vm3095_vm4, %v3305_v35 }

</bundles_post_ra>
